<compile_context>
chip_gen: v6e
topology: v6e:2x2x1
jax: 0.10.0
libtpu: 0.0.40
codegen_flags: <defaults>
</compile_context>

<pallas_src>
import jax
import jax.numpy as jnp
from jax import lax
from jax.experimental import pallas as pl
from jax.experimental.pallas import tpu as pltpu

D_MODEL = 32
D_FF = 64
VOCAB = 48
EXTRA = 16          # number of extra (copy-only) vocabulary entries
VEXT = VOCAB + EXTRA
VEXT_PAD = 128      # lane-dense padded output width
NUM_REL = 8         # number of relative-position buckets
NEG_INF = -1e9
PAD_NEG = -1e30


# --------------------------------------------------------------------------
# Fused forward kernel (one grid step per batch element)
# --------------------------------------------------------------------------
def _mha(q, k, v, mask, bias=None):
    """Masked softmax attention on VMEM-resident tiles.  Returns (out, p)."""
    scale = 1.0 / float(q.shape[-1]) ** 0.5
    # q @ k^T without an explicit transpose (contract both last dims)
    s = lax.dot_general(q, k, (((1,), (1,)), ((), ())),
                        preferred_element_type=jnp.float32) * scale
    if bias is not None:
        s = s + bias
    s = jnp.where(mask > 0, s, jnp.float32(NEG_INF))
    s = s - jnp.max(s, axis=-1, keepdims=True)
    e = jnp.exp(s)
    p = e / jnp.sum(e, axis=-1, keepdims=True)
    o = jnp.dot(p, v, preferred_element_type=jnp.float32)
    return o, p


def _fused_forward_kernel(
        # per-batch data
        src_emb_ref, tgt_emb_ref, src_mask_ref, tgt_mask_ref,
        rel_ids_ref, expx_ref, sem_ref,
        # small scalar table (SMEM)
        rel_emb_ref,
        # encoder weights
        enc_wqkv_ref, enc_bqkv_ref, enc_wo_ref, enc_bo_ref,
        enc_w1_ref, enc_b1_ref, enc_w2_ref, enc_b2_ref,
        # decoder self-attention weights
        dec_wqkv_ref, dec_bqkv_ref, dec_wo_ref, dec_bo_ref,
        # cross-attention weights
        x_wq_ref, x_bq_ref, x_wkv_ref, x_bkv_ref, x_wo_ref, x_bo_ref,
        # decoder FFN weights
        dec_w1_ref, dec_b1_ref, dec_w2_ref, dec_b2_ref,
        # generator weights
        gen_wv_ref, gen_bv_ref, pgen_w_ref, pgen_b_ref,
        # output
        out_ref):
    D = D_MODEL
    x0 = src_emb_ref[0]          # (S, D)  source embeddings
    t0 = tgt_emb_ref[0]          # (T, D)  target embeddings
    smask = src_mask_ref[0]      # (1, S)  source padding mask
    tmask = tgt_mask_ref[0]      # (T, T)  causal target mask
    S = x0.shape[0]
    T = t0.shape[0]

    # -------------------- encoder (self-attn + rel-pos bias + FFN) ----------
    qkv = (jnp.dot(x0, enc_wqkv_ref[...], preferred_element_type=jnp.float32)
           + enc_bqkv_ref[...])                                   # (S, 3D)
    q, k, v = qkv[:, :D], qkv[:, D:2 * D], qkv[:, 2 * D:3 * D]

    # relative-position bias built in-register from the 8-entry SMEM table
    rid = rel_ids_ref[0]                                          # (S, S) int32
    bias = jnp.zeros((S, S), jnp.float32)
    for r in range(NUM_REL):                                      # unrolled selects
        bias = jnp.where(rid == r, rel_emb_ref[r], bias)

    attn_out, _ = _mha(q, k, v, smask, bias)
    x = x0 + (jnp.dot(attn_out, enc_wo_ref[...],
                      preferred_element_type=jnp.float32) + enc_bo_ref[...])
    h = jnp.maximum(jnp.dot(x, enc_w1_ref[...],
                            preferred_element_type=jnp.float32) + enc_b1_ref[...], 0.0)
    x = x + (jnp.dot(h, enc_w2_ref[...],
                     preferred_element_type=jnp.float32) + enc_b2_ref[...])
    enc_out = x                                                   # (S, D)

    # -------------------- decoder masked self-attention ---------------------
    qkv = (jnp.dot(t0, dec_wqkv_ref[...], preferred_element_type=jnp.float32)
           + dec_bqkv_ref[...])                                   # (T, 3D)
    q, k, v = qkv[:, :D], qkv[:, D:2 * D], qkv[:, 2 * D:3 * D]
    self_out, _ = _mha(q, k, v, tmask, None)
    y = t0 + (jnp.dot(self_out, dec_wo_ref[...],
                      preferred_element_type=jnp.float32) + dec_bo_ref[...])

    # -------------------- cross-attention + decoder FFN ---------------------
    q = (jnp.dot(y, x_wq_ref[...], preferred_element_type=jnp.float32)
         + x_bq_ref[...])                                         # (T, D)
    kv = (jnp.dot(enc_out, x_wkv_ref[...], preferred_element_type=jnp.float32)
          + x_bkv_ref[...])                                       # (S, 2D)
    k, v = kv[:, :D], kv[:, D:]
    cross_out, attn = _mha(q, k, v, smask, None)                  # attn: (T, S)
    y = y + (jnp.dot(cross_out, x_wo_ref[...],
                     preferred_element_type=jnp.float32) + x_bo_ref[...])
    h = jnp.maximum(jnp.dot(y, dec_w1_ref[...],
                            preferred_element_type=jnp.float32) + dec_b1_ref[...], 0.0)
    y = y + (jnp.dot(h, dec_w2_ref[...],
                     preferred_element_type=jnp.float32) + dec_b2_ref[...])
    dec_out = y                                                   # (T, D)

    # -------------------- pointer-generator head ----------------------------
    # Vocab head is padded to 128 lanes; padded columns carry a -1e30 bias so
    # their probability is exactly 0 -> this IS the extended-vocab vocab_dist
    # (replaces the old identity pad_proj matmul).
    logits = (jnp.dot(dec_out, gen_wv_ref[...],
                      preferred_element_type=jnp.float32) + gen_bv_ref[...])  # (T, 128)
    logits = logits - jnp.max(logits, axis=-1, keepdims=True)
    e = jnp.exp(logits)
    vocab_ext = e / jnp.sum(e, axis=-1, keepdims=True)            # (T, 128)

    # p_gen = sigmoid([dec | ctx | temb] @ w + b)  -- single packed matmul
    ctx = jnp.dot(attn, enc_out, preferred_element_type=jnp.float32)   # (T, D)
    feat = jnp.concatenate([dec_out, ctx, t0], axis=-1)                # (T, 3D)
    g = (jnp.dot(feat, pgen_w_ref[...], preferred_element_type=jnp.float32)
         + pgen_b_ref[...])                                            # (T, 1)
    p_gen = 1.0 / (1.0 + jnp.exp(-g))

    # copy distribution over the extended vocab (semantic-masked, renormalized)
    sem = sem_ref[0]                                                   # (1, S)
    attn_c = attn * sem
    attn_c = attn_c / (jnp.sum(attn_c, axis=-1, keepdims=True) + 1e-9)
    xid = expx_ref[0]                                                  # (S, 1) int32
    xoh = (xid == lax.broadcasted_iota(jnp.int32, (S, VEXT_PAD), 1)
           ).astype(jnp.float32)                                       # (S, 128)
    copy_dist = jnp.dot(attn_c, xoh, preferred_element_type=jnp.float32)  # (T, 128)

    out_ref[0] = p_gen * vocab_ext + (1.0 - p_gen) * copy_dist


# --------------------------------------------------------------------------
# Wrappers
# --------------------------------------------------------------------------
_WEIGHT_NAMES = (
    "enc_wqkv", "enc_bqkv", "enc_wo", "enc_bo",
    "enc_w1", "enc_b1", "enc_w2", "enc_b2",
    "dec_wqkv", "dec_bqkv", "dec_wo", "dec_bo",
    "x_wq", "x_bq", "x_wkv", "x_bkv", "x_wo", "x_bo",
    "dec_w1", "dec_b1", "dec_w2", "dec_b2",
    "gen_wv", "gen_bv", "pgen_w", "pgen_b",
)


def fused_forward(packed, src_emb, tgt_emb, src_mask, tgt_mask,
                  rel_ids, expanded_x, semantic_mask):
    B, S, D = src_emb.shape
    T = tgt_emb.shape[1]
    expx = expanded_x.reshape(B, S, 1).astype(jnp.int32)
    sem = semantic_mask.reshape(B, 1, S).astype(jnp.float32)
    smask = src_mask.reshape(B, 1, S).astype(jnp.float32)
    tmask = tgt_mask.astype(jnp.float32)
    weights = [packed[n] for n in _WEIGHT_NAMES]

    def batch_spec(shape):
        return pl.BlockSpec((1,) + shape, lambda i: (i, 0, 0))

    def weight_spec(arr):  # full-array block, resident across all grid steps
        return pl.BlockSpec(arr.shape, lambda i: (0, 0))

    in_specs = [
        batch_spec((S, D)),                                   # src_emb
        batch_spec((T, D)),                                   # tgt_emb
        batch_spec((1, S)),                                   # src_mask
        batch_spec((T, T)),                                   # tgt_mask
        batch_spec((S, S)),                                   # rel_ids (int32)
        batch_spec((S, 1)),                                   # expanded_x (int32)
        batch_spec((1, S)),                                   # semantic_mask
        pl.BlockSpec(memory_space=pltpu.MemorySpace.SMEM),    # rel_emb table
    ] + [weight_spec(w) for w in weights]

    out = pl.pallas_call(
        _fused_forward_kernel,
        out_shape=jax.ShapeDtypeStruct((B, T, VEXT_PAD), jnp.float32),
        grid=(B,),
        in_specs=in_specs,
        out_specs=pl.BlockSpec((1, T, VEXT_PAD), lambda i: (i, 0, 0)),
        compiler_params=pltpu.CompilerParams(
            dimension_semantics=("parallel",)),   # v7x: split batch over 2 TCs
    )(src_emb, tgt_emb, smask, tmask, rel_ids, expx, sem,
      packed["rel_emb"], *weights)
    return out


def train_forward(packed, batch_data):
    """Equivalent of Train.forward: model.forward(...) then model.generator(...)."""
    src = batch_data["src"]
    tgt = batch_data["tgt"]
    src_mask = batch_data["src_mask"]
    tgt_mask = batch_data["tgt_mask"]
    rel_ids = batch_data["rel_ids"]
    extra_vocab = batch_data["extra_vocab"]
    expanded_x = batch_data["expanded_x"]
    semantic_mask = batch_data["semantic_mask"]

    # glue: embedding-table row gathers stay in plain JAX (dynamic gather)
    src_emb = packed["src_embed"][src]          # (B, S, D)
    tgt_emb = packed["tgt_embed"][tgt]          # (B, T, D)

    vext = VOCAB + int(extra_vocab)
    assert vext <= VEXT_PAD
    out_pad = fused_forward(packed, src_emb, tgt_emb, src_mask, tgt_mask,
                            rel_ids, expanded_x, semantic_mask)
    return out_pad[:, :, :vext]


# --------------------------------------------------------------------------
# Parameter init + packing for the fused kernel layout
# --------------------------------------------------------------------------
def init_params(key):
    keys = iter(jax.random.split(key, 32))

    def w(shape, scale=0.1):
        return (scale * jax.random.normal(next(keys), shape)).astype(jnp.float32)

    p = {}
    p["src_embed"] = w((VOCAB, D_MODEL))
    p["tgt_embed"] = w((VOCAB, D_MODEL))
    p["rel_emb"] = w((NUM_REL,))
    for name in ["enc", "dec", "x"]:
        for proj in ["q", "k", "v", "o"]:
            p[f"{name}_w{proj}"] = w((D_MODEL, D_MODEL))
            p[f"{name}_b{proj}"] = jnp.zeros((D_MODEL,), jnp.float32)
    for name in ["enc", "dec"]:
        p[f"{name}_w1"] = w((D_MODEL, D_FF))
        p[f"{name}_b1"] = jnp.zeros((D_FF,), jnp.float32)
        p[f"{name}_w2"] = w((D_FF, D_MODEL))
        p[f"{name}_b2"] = jnp.zeros((D_MODEL,), jnp.float32)
    p["gen_wv"] = w((D_MODEL, VOCAB))
    p["gen_bv"] = jnp.zeros((VOCAB,), jnp.float32)
    p["pgen_w_dec"] = w((1, D_MODEL))
    p["pgen_w_ctx"] = w((1, D_MODEL))
    p["pgen_w_emb"] = w((1, D_MODEL))
    p["pgen_b"] = jnp.zeros((1, 1), jnp.float32)
    return p


def pack_params(p):
    """Pack logical weights into the fused-kernel layout (QKV/KV/p_gen fused,
    vocab head padded to 128 lanes)."""
    def cat_w(names):
        return jnp.concatenate([p[n] for n in names], axis=1)

    def cat_b(names):
        return jnp.concatenate([p[n] for n in names]).reshape(1, -1)

    packed = {
        "enc_wqkv": cat_w(["enc_wq", "enc_wk", "enc_wv"]),        # (D, 3D)
        "enc_bqkv": cat_b(["enc_bq", "enc_bk", "enc_bv"]),        # (1, 3D)
        "enc_wo": p["enc_wo"], "enc_bo": p["enc_bo"].reshape(1, -1),
        "enc_w1": p["enc_w1"], "enc_b1": p["enc_b1"].reshape(1, -1),
        "enc_w2": p["enc_w2"], "enc_b2": p["enc_b2"].reshape(1, -1),
        "dec_wqkv": cat_w(["dec_wq", "dec_wk", "dec_wv"]),
        "dec_bqkv": cat_b(["dec_bq", "dec_bk", "dec_bv"]),
        "dec_wo": p["dec_wo"], "dec_bo": p["dec_bo"].reshape(1, -1),
        "x_wq": p["x_wq"], "x_bq": p["x_bq"].reshape(1, -1),
        "x_wkv": cat_w(["x_wk", "x_wv"]),                         # (D, 2D)
        "x_bkv": cat_b(["x_bk", "x_bv"]),                         # (1, 2D)
        "x_wo": p["x_wo"], "x_bo": p["x_bo"].reshape(1, -1),
        "dec_w1": p["dec_w1"], "dec_b1": p["dec_b1"].reshape(1, -1),
        "dec_w2": p["dec_w2"], "dec_b2": p["dec_b2"].reshape(1, -1),
        # vocab head padded to 128 lanes; -1e30 bias on padded columns makes
        # their softmax probability exactly 0 (replaces pad_proj identity matmul)
        "gen_wv": jnp.pad(p["gen_wv"], ((0, 0), (0, VEXT_PAD - VOCAB))),
        "gen_bv": jnp.concatenate(
            [p["gen_bv"],
             jnp.full((VEXT_PAD - VOCAB,), PAD_NEG, jnp.float32)]).reshape(1, VEXT_PAD),
        "pgen_w": jnp.concatenate(
            [p["pgen_w_dec"], p["pgen_w_ctx"], p["pgen_w_emb"]], axis=1).T,  # (3D, 1)
        "pgen_b": p["pgen_b"],
        "rel_emb": p["rel_emb"],
        "src_embed": p["src_embed"],
        "tgt_embed": p["tgt_embed"],
    }
    return packed


# --------------------------------------------------------------------------
if __name__ == "__main__":
    B, S, T = 2, 16, 8
    key = jax.random.PRNGKey(0)
    kp, k1, k2, k3, k4, k5 = jax.random.split(key, 6)

    params = init_params(kp)
    packed = pack_params(params)

    src = jax.random.randint(k1, (B, S), 0, VOCAB, dtype=jnp.int32)
    tgt = jax.random.randint(k2, (B, T), 0, VOCAB, dtype=jnp.int32)

    # source padding mask: lengths [16, 12]
    lengths = jnp.array([S, S - 4], dtype=jnp.int32)
    src_mask = (jnp.arange(S)[None, :] < lengths[:, None]).astype(jnp.float32)
    src_mask = src_mask.reshape(B, 1, S)

    # causal target mask
    tgt_mask = jnp.broadcast_to(
        jnp.tril(jnp.ones((T, T), jnp.float32))[None], (B, T, T))

    rel_ids = jax.random.randint(k3, (B, S, S), 0, NUM_REL, dtype=jnp.int32)
    expanded_x = jax.random.randint(k4, (B, S), 0, VEXT, dtype=jnp.int32)
    semantic_mask = jax.random.bernoulli(k5, 0.6, (B, S)).astype(jnp.float32)
    semantic_mask = semantic_mask.at[:, 0].set(1.0)  # guarantee >=1 copyable token

    batch_data = {
        "src": src,
        "tgt": tgt,
        "src_mask": src_mask,
        "tgt_mask": tgt_mask,
        "rel_ids": rel_ids,
        "extra_vocab": EXTRA,        # static size of the extended-vocab tail
        "expanded_x": expanded_x,
        "semantic_mask": semantic_mask,
    }

    out = train_forward(packed, batch_data)
    out = jax.block_until_ready(out)

    assert out.shape == (B, T, VEXT), out.shape
    assert bool(jnp.all(jnp.isfinite(out)))
    # distributions should (approximately) sum to 1 over the extended vocab
    assert bool(jnp.all(jnp.abs(jnp.sum(out, axis=-1) - 1.0) < 1e-3))
    print("KERNEL_OK")
</pallas_src>

<mosaic_0001>
module attributes {stable_mosaic.version = 11 : i64} {
  func.func @_fused_forward_kernel(%arg0: i32, %arg1: memref<1x16x32xf32, #tpu.memory_space<vmem>>, %arg2: memref<1x8x32xf32, #tpu.memory_space<vmem>>, %arg3: memref<1x1x16xf32, #tpu.memory_space<vmem>>, %arg4: memref<1x8x8xf32, #tpu.memory_space<vmem>>, %arg5: memref<1x16x16xi32, #tpu.memory_space<vmem>>, %arg6: memref<1x16x1xi32, #tpu.memory_space<vmem>>, %arg7: memref<1x1x16xf32, #tpu.memory_space<vmem>>, %arg8: memref<8xf32, #tpu.memory_space<smem>>, %arg9: memref<32x96xf32, #tpu.memory_space<vmem>>, %arg10: memref<1x96xf32, #tpu.memory_space<vmem>>, %arg11: memref<32x32xf32, #tpu.memory_space<vmem>>, %arg12: memref<1x32xf32, #tpu.memory_space<vmem>>, %arg13: memref<32x64xf32, #tpu.memory_space<vmem>>, %arg14: memref<1x64xf32, #tpu.memory_space<vmem>>, %arg15: memref<64x32xf32, #tpu.memory_space<vmem>>, %arg16: memref<1x32xf32, #tpu.memory_space<vmem>>, %arg17: memref<32x96xf32, #tpu.memory_space<vmem>>, %arg18: memref<1x96xf32, #tpu.memory_space<vmem>>, %arg19: memref<32x32xf32, #tpu.memory_space<vmem>>, %arg20: memref<1x32xf32, #tpu.memory_space<vmem>>, %arg21: memref<32x32xf32, #tpu.memory_space<vmem>>, %arg22: memref<1x32xf32, #tpu.memory_space<vmem>>, %arg23: memref<32x64xf32, #tpu.memory_space<vmem>>, %arg24: memref<1x64xf32, #tpu.memory_space<vmem>>, %arg25: memref<32x32xf32, #tpu.memory_space<vmem>>, %arg26: memref<1x32xf32, #tpu.memory_space<vmem>>, %arg27: memref<32x64xf32, #tpu.memory_space<vmem>>, %arg28: memref<1x64xf32, #tpu.memory_space<vmem>>, %arg29: memref<64x32xf32, #tpu.memory_space<vmem>>, %arg30: memref<1x32xf32, #tpu.memory_space<vmem>>, %arg31: memref<32x128xf32, #tpu.memory_space<vmem>>, %arg32: memref<1x128xf32, #tpu.memory_space<vmem>>, %arg33: memref<96x1xf32, #tpu.memory_space<vmem>>, %arg34: memref<1x1xf32, #tpu.memory_space<vmem>>, %arg35: memref<1x8x128xf32, #tpu.memory_space<vmem>>) attributes {dimension_semantics = [#tpu.dimension_semantics<parallel>], iteration_bounds = array<i64: 2>, scalar_prefetch = 0 : i64, scratch_operands = 0 : i64, tpu.core_type = #tpu.core_type<tc>, window_params = [{transform_indices = @transform_0, window_bounds = array<i64: 1, 16, 32>}, {transform_indices = @transform_1, window_bounds = array<i64: 1, 8, 32>}, {transform_indices = @transform_2, window_bounds = array<i64: 1, 1, 16>}, {transform_indices = @transform_3, window_bounds = array<i64: 1, 8, 8>}, {transform_indices = @transform_4, window_bounds = array<i64: 1, 16, 16>}, {transform_indices = @transform_5, window_bounds = array<i64: 1, 16, 1>}, {transform_indices = @transform_6, window_bounds = array<i64: 1, 1, 16>}, {transform_indices = @transform_7, window_bounds = array<i64: 8>}, {pipeline_mode = #tpu.pipeline_mode<synchronous>, transform_indices = @transform_8, window_bounds = array<i64: 32, 96>}, {pipeline_mode = #tpu.pipeline_mode<synchronous>, transform_indices = @transform_9, window_bounds = array<i64: 1, 96>}, {pipeline_mode = #tpu.pipeline_mode<synchronous>, transform_indices = @transform_10, window_bounds = array<i64: 32, 32>}, {pipeline_mode = #tpu.pipeline_mode<synchronous>, transform_indices = @transform_11, window_bounds = array<i64: 1, 32>}, {pipeline_mode = #tpu.pipeline_mode<synchronous>, transform_indices = @transform_12, window_bounds = array<i64: 32, 64>}, {pipeline_mode = #tpu.pipeline_mode<synchronous>, transform_indices = @transform_13, window_bounds = array<i64: 1, 64>}, {pipeline_mode = #tpu.pipeline_mode<synchronous>, transform_indices = @transform_14, window_bounds = array<i64: 64, 32>}, {pipeline_mode = #tpu.pipeline_mode<synchronous>, transform_indices = @transform_15, window_bounds = array<i64: 1, 32>}, {pipeline_mode = #tpu.pipeline_mode<synchronous>, transform_indices = @transform_16, window_bounds = array<i64: 32, 96>}, {pipeline_mode = #tpu.pipeline_mode<synchronous>, transform_indices = @transform_17, window_bounds = array<i64: 1, 96>}, {pipeline_mode = #tpu.pipeline_mode<synchronous>, transform_indices = @transform_18, window_bounds = array<i64: 32, 32>}, {pipeline_mode = #tpu.pipeline_mode<synchronous>, transform_indices = @transform_19, window_bounds = array<i64: 1, 32>}, {pipeline_mode = #tpu.pipeline_mode<synchronous>, transform_indices = @transform_20, window_bounds = array<i64: 32, 32>}, {pipeline_mode = #tpu.pipeline_mode<synchronous>, transform_indices = @transform_21, window_bounds = array<i64: 1, 32>}, {pipeline_mode = #tpu.pipeline_mode<synchronous>, transform_indices = @transform_22, window_bounds = array<i64: 32, 64>}, {pipeline_mode = #tpu.pipeline_mode<synchronous>, transform_indices = @transform_23, window_bounds = array<i64: 1, 64>}, {pipeline_mode = #tpu.pipeline_mode<synchronous>, transform_indices = @transform_24, window_bounds = array<i64: 32, 32>}, {pipeline_mode = #tpu.pipeline_mode<synchronous>, transform_indices = @transform_25, window_bounds = array<i64: 1, 32>}, {pipeline_mode = #tpu.pipeline_mode<synchronous>, transform_indices = @transform_26, window_bounds = array<i64: 32, 64>}, {pipeline_mode = #tpu.pipeline_mode<synchronous>, transform_indices = @transform_27, window_bounds = array<i64: 1, 64>}, {pipeline_mode = #tpu.pipeline_mode<synchronous>, transform_indices = @transform_28, window_bounds = array<i64: 64, 32>}, {pipeline_mode = #tpu.pipeline_mode<synchronous>, transform_indices = @transform_29, window_bounds = array<i64: 1, 32>}, {pipeline_mode = #tpu.pipeline_mode<synchronous>, transform_indices = @transform_30, window_bounds = array<i64: 32, 128>}, {pipeline_mode = #tpu.pipeline_mode<synchronous>, transform_indices = @transform_31, window_bounds = array<i64: 1, 128>}, {pipeline_mode = #tpu.pipeline_mode<synchronous>, transform_indices = @transform_32, window_bounds = array<i64: 96, 1>}, {pipeline_mode = #tpu.pipeline_mode<synchronous>, transform_indices = @transform_33, window_bounds = array<i64: 1, 1>}, {transform_indices = @transform_34, window_bounds = array<i64: 1, 8, 128>}]} {
    %c0 = arith.constant 0 : index
    %c0_0 = arith.constant 0 : index
    %c0_1 = arith.constant 0 : index
    %0 = vector.load %arg1[%c0, %c0_0, %c0_1] : memref<1x16x32xf32, #tpu.memory_space<vmem>>, vector<1x16x32xf32>
    %1 = vector.shape_cast %0 : vector<1x16x32xf32> to vector<16x32xf32>
    %c0_2 = arith.constant 0 : index
    %c0_3 = arith.constant 0 : index
    %c0_4 = arith.constant 0 : index
    %2 = vector.load %arg2[%c0_2, %c0_3, %c0_4] : memref<1x8x32xf32, #tpu.memory_space<vmem>>, vector<1x8x32xf32>
    %3 = vector.shape_cast %2 : vector<1x8x32xf32> to vector<8x32xf32>
    %c0_5 = arith.constant 0 : index
    %c0_6 = arith.constant 0 : index
    %c0_7 = arith.constant 0 : index
    %4 = vector.load %arg3[%c0_5, %c0_6, %c0_7] : memref<1x1x16xf32, #tpu.memory_space<vmem>>, vector<1x1x16xf32>
    %5 = vector.shape_cast %4 : vector<1x1x16xf32> to vector<1x16xf32>
    %c0_8 = arith.constant 0 : index
    %c0_9 = arith.constant 0 : index
    %c0_10 = arith.constant 0 : index
    %6 = vector.load %arg4[%c0_8, %c0_9, %c0_10] : memref<1x8x8xf32, #tpu.memory_space<vmem>>, vector<1x8x8xf32>
    %7 = vector.shape_cast %6 : vector<1x8x8xf32> to vector<8x8xf32>
    %c0_11 = arith.constant 0 : index
    %c0_12 = arith.constant 0 : index
    %8 = vector.load %arg9[%c0_11, %c0_12] : memref<32x96xf32, #tpu.memory_space<vmem>>, vector<32x96xf32>
    %cst = arith.constant dense<0.000000e+00> : vector<16x96xf32>
    %9 = tpu.matmul %1, %8, %cst {dimension_numbers = #tpu.dot_dimension_numbers<[1], [0], [0], [1], [0, 0, 1, 1], [], []>} : vector<16x32xf32>, vector<32x96xf32>, vector<16x96xf32> -> vector<16x96xf32>
    %c0_13 = arith.constant 0 : index
    %c0_14 = arith.constant 0 : index
    %10 = vector.load %arg10[%c0_13, %c0_14] : memref<1x96xf32, #tpu.memory_space<vmem>>, vector<1x96xf32>
    %11 = vector.broadcast %10 : vector<1x96xf32> to vector<16x96xf32>
    %12 = arith.addf %9, %11 : vector<16x96xf32>
    %13 = vector.extract_strided_slice %12 {offsets = [0, 0], sizes = [16, 32], strides = [1, 1]} : vector<16x96xf32> to vector<16x32xf32>
    %14 = vector.extract_strided_slice %12 {offsets = [0, 32], sizes = [16, 32], strides = [1, 1]} : vector<16x96xf32> to vector<16x32xf32>
    %15 = vector.extract_strided_slice %12 {offsets = [0, 64], sizes = [16, 32], strides = [1, 1]} : vector<16x96xf32> to vector<16x32xf32>
    %c0_15 = arith.constant 0 : index
    %c0_16 = arith.constant 0 : index
    %c0_17 = arith.constant 0 : index
    %16 = vector.load %arg5[%c0_15, %c0_16, %c0_17] : memref<1x16x16xi32, #tpu.memory_space<vmem>>, vector<1x16x16xi32>
    %17 = vector.shape_cast %16 : vector<1x16x16xi32> to vector<16x16xi32>
    %cst_18 = arith.constant 0.000000e+00 : f32
    %18 = vector.broadcast %cst_18 : f32 to vector<16x16xf32>
    %c0_i32 = arith.constant 0 : i32
    %19 = vector.broadcast %c0_i32 : i32 to vector<16x16xi32>
    %20 = arith.cmpi eq, %17, %19 : vector<16x16xi32>
    %c0_19 = arith.constant 0 : index
    %21 = memref.load %arg8[%c0_19] : memref<8xf32, #tpu.memory_space<smem>>
    %22 = vector.broadcast %21 : f32 to vector<16x16xf32>
    %23 = arith.select %20, %22, %18 : vector<16x16xi1>, vector<16x16xf32>
    %c1_i32 = arith.constant 1 : i32
    %24 = vector.broadcast %c1_i32 : i32 to vector<16x16xi32>
    %25 = arith.cmpi eq, %17, %24 : vector<16x16xi32>
    %c1 = arith.constant 1 : index
    %26 = memref.load %arg8[%c1] : memref<8xf32, #tpu.memory_space<smem>>
    %27 = vector.broadcast %26 : f32 to vector<16x16xf32>
    %28 = arith.select %25, %27, %23 : vector<16x16xi1>, vector<16x16xf32>
    %c2_i32 = arith.constant 2 : i32
    %29 = vector.broadcast %c2_i32 : i32 to vector<16x16xi32>
    %30 = arith.cmpi eq, %17, %29 : vector<16x16xi32>
    %c2 = arith.constant 2 : index
    %31 = memref.load %arg8[%c2] : memref<8xf32, #tpu.memory_space<smem>>
    %32 = vector.broadcast %31 : f32 to vector<16x16xf32>
    %33 = arith.select %30, %32, %28 : vector<16x16xi1>, vector<16x16xf32>
    %c3_i32 = arith.constant 3 : i32
    %34 = vector.broadcast %c3_i32 : i32 to vector<16x16xi32>
    %35 = arith.cmpi eq, %17, %34 : vector<16x16xi32>
    %c3 = arith.constant 3 : index
    %36 = memref.load %arg8[%c3] : memref<8xf32, #tpu.memory_space<smem>>
    %37 = vector.broadcast %36 : f32 to vector<16x16xf32>
    %38 = arith.select %35, %37, %33 : vector<16x16xi1>, vector<16x16xf32>
    %c4_i32 = arith.constant 4 : i32
    %39 = vector.broadcast %c4_i32 : i32 to vector<16x16xi32>
    %40 = arith.cmpi eq, %17, %39 : vector<16x16xi32>
    %c4 = arith.constant 4 : index
    %41 = memref.load %arg8[%c4] : memref<8xf32, #tpu.memory_space<smem>>
    %42 = vector.broadcast %41 : f32 to vector<16x16xf32>
    %43 = arith.select %40, %42, %38 : vector<16x16xi1>, vector<16x16xf32>
    %c5_i32 = arith.constant 5 : i32
    %44 = vector.broadcast %c5_i32 : i32 to vector<16x16xi32>
    %45 = arith.cmpi eq, %17, %44 : vector<16x16xi32>
    %c5 = arith.constant 5 : index
    %46 = memref.load %arg8[%c5] : memref<8xf32, #tpu.memory_space<smem>>
    %47 = vector.broadcast %46 : f32 to vector<16x16xf32>
    %48 = arith.select %45, %47, %43 : vector<16x16xi1>, vector<16x16xf32>
    %c6_i32 = arith.constant 6 : i32
    %49 = vector.broadcast %c6_i32 : i32 to vector<16x16xi32>
    %50 = arith.cmpi eq, %17, %49 : vector<16x16xi32>
    %c6 = arith.constant 6 : index
    %51 = memref.load %arg8[%c6] : memref<8xf32, #tpu.memory_space<smem>>
    %52 = vector.broadcast %51 : f32 to vector<16x16xf32>
    %53 = arith.select %50, %52, %48 : vector<16x16xi1>, vector<16x16xf32>
    %c7_i32 = arith.constant 7 : i32
    %54 = vector.broadcast %c7_i32 : i32 to vector<16x16xi32>
    %55 = arith.cmpi eq, %17, %54 : vector<16x16xi32>
    %c7 = arith.constant 7 : index
    %56 = memref.load %arg8[%c7] : memref<8xf32, #tpu.memory_space<smem>>
    %57 = vector.broadcast %56 : f32 to vector<16x16xf32>
    %58 = arith.select %55, %57, %53 : vector<16x16xi1>, vector<16x16xf32>
    %cst_20 = arith.constant dense<0.000000e+00> : vector<16x16xf32>
    %59 = tpu.matmul %13, %14, %cst_20 {dimension_numbers = #tpu.dot_dimension_numbers<[1], [1], [0], [0], [0, 0, 1, 0], [], []>} : vector<16x32xf32>, vector<16x32xf32>, vector<16x16xf32> -> vector<16x16xf32>
    %cst_21 = arith.constant 0.176776692 : f32
    %60 = vector.broadcast %cst_21 : f32 to vector<16x16xf32>
    %61 = arith.mulf %59, %60 : vector<16x16xf32>
    %62 = arith.addf %61, %58 : vector<16x16xf32>
    %cst_22 = arith.constant 0.000000e+00 : f32
    %63 = vector.broadcast %cst_22 : f32 to vector<1x16xf32>
    %64 = arith.cmpf ogt, %5, %63 : vector<1x16xf32>
    %cst_23 = arith.constant -1.000000e+09 : f32
    %65 = vector.shape_cast %64 : vector<1x16xi1> to vector<1x16xi1>
    %66 = vector.broadcast %65 : vector<1x16xi1> to vector<16x16xi1>
    %67 = vector.broadcast %cst_23 : f32 to vector<16x16xf32>
    %68 = arith.select %66, %62, %67 : vector<16x16xi1>, vector<16x16xf32>
    %cst_24 = arith.constant dense<0xFF800000> : vector<16xf32>
    %69 = vector.multi_reduction <maximumf>, %68, %cst_24 [1] : vector<16x16xf32> to vector<16xf32>
    %70 = vector.shape_cast %69 : vector<16xf32> to vector<16x1xf32>
    %71 = vector.broadcast %70 : vector<16x1xf32> to vector<16x16xf32>
    %72 = arith.subf %68, %71 : vector<16x16xf32>
    %73 = math.exp %72 : vector<16x16xf32>
    %cst_25 = arith.constant dense<0.000000e+00> : vector<16xf32>
    %74 = vector.multi_reduction <add>, %73, %cst_25 [1] : vector<16x16xf32> to vector<16xf32>
    %75 = vector.shape_cast %74 : vector<16xf32> to vector<16x1xf32>
    %76 = vector.broadcast %75 : vector<16x1xf32> to vector<16x16xf32>
    %77 = arith.divf %73, %76 : vector<16x16xf32>
    %cst_26 = arith.constant dense<0.000000e+00> : vector<16x32xf32>
    %78 = tpu.matmul %77, %15, %cst_26 {dimension_numbers = #tpu.dot_dimension_numbers<[1], [0], [0], [1], [0, 0, 1, 1], [], []>} : vector<16x16xf32>, vector<16x32xf32>, vector<16x32xf32> -> vector<16x32xf32>
    %c0_27 = arith.constant 0 : index
    %c0_28 = arith.constant 0 : index
    %79 = vector.load %arg11[%c0_27, %c0_28] : memref<32x32xf32, #tpu.memory_space<vmem>>, vector<32x32xf32>
    %cst_29 = arith.constant dense<0.000000e+00> : vector<16x32xf32>
    %80 = tpu.matmul %78, %79, %cst_29 {dimension_numbers = #tpu.dot_dimension_numbers<[1], [0], [0], [1], [0, 0, 1, 1], [], []>} : vector<16x32xf32>, vector<32x32xf32>, vector<16x32xf32> -> vector<16x32xf32>
    %c0_30 = arith.constant 0 : index
    %c0_31 = arith.constant 0 : index
    %81 = vector.load %arg12[%c0_30, %c0_31] : memref<1x32xf32, #tpu.memory_space<vmem>>, vector<1x32xf32>
    %82 = vector.broadcast %81 : vector<1x32xf32> to vector<16x32xf32>
    %83 = arith.addf %80, %82 : vector<16x32xf32>
    %84 = arith.addf %1, %83 : vector<16x32xf32>
    %c0_32 = arith.constant 0 : index
    %c0_33 = arith.constant 0 : index
    %85 = vector.load %arg13[%c0_32, %c0_33] : memref<32x64xf32, #tpu.memory_space<vmem>>, vector<32x64xf32>
    %cst_34 = arith.constant dense<0.000000e+00> : vector<16x64xf32>
    %86 = tpu.matmul %84, %85, %cst_34 {dimension_numbers = #tpu.dot_dimension_numbers<[1], [0], [0], [1], [0, 0, 1, 1], [], []>} : vector<16x32xf32>, vector<32x64xf32>, vector<16x64xf32> -> vector<16x64xf32>
    %c0_35 = arith.constant 0 : index
    %c0_36 = arith.constant 0 : index
    %87 = vector.load %arg14[%c0_35, %c0_36] : memref<1x64xf32, #tpu.memory_space<vmem>>, vector<1x64xf32>
    %88 = vector.broadcast %87 : vector<1x64xf32> to vector<16x64xf32>
    %89 = arith.addf %86, %88 : vector<16x64xf32>
    %cst_37 = arith.constant 0.000000e+00 : f32
    %90 = vector.broadcast %cst_37 : f32 to vector<16x64xf32>
    %91 = arith.maximumf %89, %90 : vector<16x64xf32>
    %c0_38 = arith.constant 0 : index
    %c0_39 = arith.constant 0 : index
    %92 = vector.load %arg15[%c0_38, %c0_39] : memref<64x32xf32, #tpu.memory_space<vmem>>, vector<64x32xf32>
    %cst_40 = arith.constant dense<0.000000e+00> : vector<16x32xf32>
    %93 = tpu.matmul %91, %92, %cst_40 {dimension_numbers = #tpu.dot_dimension_numbers<[1], [0], [0], [1], [0, 0, 1, 1], [], []>} : vector<16x64xf32>, vector<64x32xf32>, vector<16x32xf32> -> vector<16x32xf32>
    %c0_41 = arith.constant 0 : index
    %c0_42 = arith.constant 0 : index
    %94 = vector.load %arg16[%c0_41, %c0_42] : memref<1x32xf32, #tpu.memory_space<vmem>>, vector<1x32xf32>
    %95 = vector.broadcast %94 : vector<1x32xf32> to vector<16x32xf32>
    %96 = arith.addf %93, %95 : vector<16x32xf32>
    %97 = arith.addf %84, %96 : vector<16x32xf32>
    %c0_43 = arith.constant 0 : index
    %c0_44 = arith.constant 0 : index
    %98 = vector.load %arg17[%c0_43, %c0_44] : memref<32x96xf32, #tpu.memory_space<vmem>>, vector<32x96xf32>
    %cst_45 = arith.constant dense<0.000000e+00> : vector<8x96xf32>
    %99 = tpu.matmul %3, %98, %cst_45 {dimension_numbers = #tpu.dot_dimension_numbers<[1], [0], [0], [1], [0, 0, 1, 1], [], []>} : vector<8x32xf32>, vector<32x96xf32>, vector<8x96xf32> -> vector<8x96xf32>
    %c0_46 = arith.constant 0 : index
    %c0_47 = arith.constant 0 : index
    %100 = vector.load %arg18[%c0_46, %c0_47] : memref<1x96xf32, #tpu.memory_space<vmem>>, vector<1x96xf32>
    %101 = vector.broadcast %100 : vector<1x96xf32> to vector<8x96xf32>
    %102 = arith.addf %99, %101 : vector<8x96xf32>
    %103 = vector.extract_strided_slice %102 {offsets = [0, 0], sizes = [8, 32], strides = [1, 1]} : vector<8x96xf32> to vector<8x32xf32>
    %104 = vector.extract_strided_slice %102 {offsets = [0, 32], sizes = [8, 32], strides = [1, 1]} : vector<8x96xf32> to vector<8x32xf32>
    %105 = vector.extract_strided_slice %102 {offsets = [0, 64], sizes = [8, 32], strides = [1, 1]} : vector<8x96xf32> to vector<8x32xf32>
    %cst_48 = arith.constant dense<0.000000e+00> : vector<8x8xf32>
    %106 = tpu.matmul %103, %104, %cst_48 {dimension_numbers = #tpu.dot_dimension_numbers<[1], [1], [0], [0], [0, 0, 1, 0], [], []>} : vector<8x32xf32>, vector<8x32xf32>, vector<8x8xf32> -> vector<8x8xf32>
    %cst_49 = arith.constant 0.176776692 : f32
    %107 = vector.broadcast %cst_49 : f32 to vector<8x8xf32>
    %108 = arith.mulf %106, %107 : vector<8x8xf32>
    %cst_50 = arith.constant 0.000000e+00 : f32
    %109 = vector.broadcast %cst_50 : f32 to vector<8x8xf32>
    %110 = arith.cmpf ogt, %7, %109 : vector<8x8xf32>
    %cst_51 = arith.constant -1.000000e+09 : f32
    %111 = vector.broadcast %cst_51 : f32 to vector<8x8xf32>
    %112 = arith.select %110, %108, %111 : vector<8x8xi1>, vector<8x8xf32>
    %cst_52 = arith.constant dense<0xFF800000> : vector<8xf32>
    %113 = vector.multi_reduction <maximumf>, %112, %cst_52 [1] : vector<8x8xf32> to vector<8xf32>
    %114 = vector.shape_cast %113 : vector<8xf32> to vector<8x1xf32>
    %115 = vector.broadcast %114 : vector<8x1xf32> to vector<8x8xf32>
    %116 = arith.subf %112, %115 : vector<8x8xf32>
    %117 = math.exp %116 : vector<8x8xf32>
    %cst_53 = arith.constant dense<0.000000e+00> : vector<8xf32>
    %118 = vector.multi_reduction <add>, %117, %cst_53 [1] : vector<8x8xf32> to vector<8xf32>
    %119 = vector.shape_cast %118 : vector<8xf32> to vector<8x1xf32>
    %120 = vector.broadcast %119 : vector<8x1xf32> to vector<8x8xf32>
    %121 = arith.divf %117, %120 : vector<8x8xf32>
    %cst_54 = arith.constant dense<0.000000e+00> : vector<8x32xf32>
    %122 = tpu.matmul %121, %105, %cst_54 {dimension_numbers = #tpu.dot_dimension_numbers<[1], [0], [0], [1], [0, 0, 1, 1], [], []>} : vector<8x8xf32>, vector<8x32xf32>, vector<8x32xf32> -> vector<8x32xf32>
    %c0_55 = arith.constant 0 : index
    %c0_56 = arith.constant 0 : index
    %123 = vector.load %arg19[%c0_55, %c0_56] : memref<32x32xf32, #tpu.memory_space<vmem>>, vector<32x32xf32>
    %cst_57 = arith.constant dense<0.000000e+00> : vector<8x32xf32>
    %124 = tpu.matmul %122, %123, %cst_57 {dimension_numbers = #tpu.dot_dimension_numbers<[1], [0], [0], [1], [0, 0, 1, 1], [], []>} : vector<8x32xf32>, vector<32x32xf32>, vector<8x32xf32> -> vector<8x32xf32>
    %c0_58 = arith.constant 0 : index
    %c0_59 = arith.constant 0 : index
    %125 = vector.load %arg20[%c0_58, %c0_59] : memref<1x32xf32, #tpu.memory_space<vmem>>, vector<1x32xf32>
    %126 = vector.broadcast %125 : vector<1x32xf32> to vector<8x32xf32>
    %127 = arith.addf %124, %126 : vector<8x32xf32>
    %128 = arith.addf %3, %127 : vector<8x32xf32>
    %c0_60 = arith.constant 0 : index
    %c0_61 = arith.constant 0 : index
    %129 = vector.load %arg21[%c0_60, %c0_61] : memref<32x32xf32, #tpu.memory_space<vmem>>, vector<32x32xf32>
    %cst_62 = arith.constant dense<0.000000e+00> : vector<8x32xf32>
    %130 = tpu.matmul %128, %129, %cst_62 {dimension_numbers = #tpu.dot_dimension_numbers<[1], [0], [0], [1], [0, 0, 1, 1], [], []>} : vector<8x32xf32>, vector<32x32xf32>, vector<8x32xf32> -> vector<8x32xf32>
    %c0_63 = arith.constant 0 : index
    %c0_64 = arith.constant 0 : index
    %131 = vector.load %arg22[%c0_63, %c0_64] : memref<1x32xf32, #tpu.memory_space<vmem>>, vector<1x32xf32>
    %132 = vector.broadcast %131 : vector<1x32xf32> to vector<8x32xf32>
    %133 = arith.addf %130, %132 : vector<8x32xf32>
    %c0_65 = arith.constant 0 : index
    %c0_66 = arith.constant 0 : index
    %134 = vector.load %arg23[%c0_65, %c0_66] : memref<32x64xf32, #tpu.memory_space<vmem>>, vector<32x64xf32>
    %cst_67 = arith.constant dense<0.000000e+00> : vector<16x64xf32>
    %135 = tpu.matmul %97, %134, %cst_67 {dimension_numbers = #tpu.dot_dimension_numbers<[1], [0], [0], [1], [0, 0, 1, 1], [], []>} : vector<16x32xf32>, vector<32x64xf32>, vector<16x64xf32> -> vector<16x64xf32>
    %c0_68 = arith.constant 0 : index
    %c0_69 = arith.constant 0 : index
    %136 = vector.load %arg24[%c0_68, %c0_69] : memref<1x64xf32, #tpu.memory_space<vmem>>, vector<1x64xf32>
    %137 = vector.broadcast %136 : vector<1x64xf32> to vector<16x64xf32>
    %138 = arith.addf %135, %137 : vector<16x64xf32>
    %139 = vector.extract_strided_slice %138 {offsets = [0, 0], sizes = [16, 32], strides = [1, 1]} : vector<16x64xf32> to vector<16x32xf32>
    %140 = vector.extract_strided_slice %138 {offsets = [0, 32], sizes = [16, 32], strides = [1, 1]} : vector<16x64xf32> to vector<16x32xf32>
    %cst_70 = arith.constant dense<0.000000e+00> : vector<8x16xf32>
    %141 = tpu.matmul %133, %139, %cst_70 {dimension_numbers = #tpu.dot_dimension_numbers<[1], [1], [0], [0], [0, 0, 1, 0], [], []>} : vector<8x32xf32>, vector<16x32xf32>, vector<8x16xf32> -> vector<8x16xf32>
    %cst_71 = arith.constant 0.176776692 : f32
    %142 = vector.broadcast %cst_71 : f32 to vector<8x16xf32>
    %143 = arith.mulf %141, %142 : vector<8x16xf32>
    %cst_72 = arith.constant 0.000000e+00 : f32
    %144 = vector.broadcast %cst_72 : f32 to vector<1x16xf32>
    %145 = arith.cmpf ogt, %5, %144 : vector<1x16xf32>
    %cst_73 = arith.constant -1.000000e+09 : f32
    %146 = vector.shape_cast %145 : vector<1x16xi1> to vector<1x16xi1>
    %147 = vector.broadcast %146 : vector<1x16xi1> to vector<8x16xi1>
    %148 = vector.broadcast %cst_73 : f32 to vector<8x16xf32>
    %149 = arith.select %147, %143, %148 : vector<8x16xi1>, vector<8x16xf32>
    %cst_74 = arith.constant dense<0xFF800000> : vector<8xf32>
    %150 = vector.multi_reduction <maximumf>, %149, %cst_74 [1] : vector<8x16xf32> to vector<8xf32>
    %151 = vector.shape_cast %150 : vector<8xf32> to vector<8x1xf32>
    %152 = vector.broadcast %151 : vector<8x1xf32> to vector<8x16xf32>
    %153 = arith.subf %149, %152 : vector<8x16xf32>
    %154 = math.exp %153 : vector<8x16xf32>
    %cst_75 = arith.constant dense<0.000000e+00> : vector<8xf32>
    %155 = vector.multi_reduction <add>, %154, %cst_75 [1] : vector<8x16xf32> to vector<8xf32>
    %156 = vector.shape_cast %155 : vector<8xf32> to vector<8x1xf32>
    %157 = vector.broadcast %156 : vector<8x1xf32> to vector<8x16xf32>
    %158 = arith.divf %154, %157 : vector<8x16xf32>
    %cst_76 = arith.constant dense<0.000000e+00> : vector<8x32xf32>
    %159 = tpu.matmul %158, %140, %cst_76 {dimension_numbers = #tpu.dot_dimension_numbers<[1], [0], [0], [1], [0, 0, 1, 1], [], []>} : vector<8x16xf32>, vector<16x32xf32>, vector<8x32xf32> -> vector<8x32xf32>
    %c0_77 = arith.constant 0 : index
    %c0_78 = arith.constant 0 : index
    %160 = vector.load %arg25[%c0_77, %c0_78] : memref<32x32xf32, #tpu.memory_space<vmem>>, vector<32x32xf32>
    %cst_79 = arith.constant dense<0.000000e+00> : vector<8x32xf32>
    %161 = tpu.matmul %159, %160, %cst_79 {dimension_numbers = #tpu.dot_dimension_numbers<[1], [0], [0], [1], [0, 0, 1, 1], [], []>} : vector<8x32xf32>, vector<32x32xf32>, vector<8x32xf32> -> vector<8x32xf32>
    %c0_80 = arith.constant 0 : index
    %c0_81 = arith.constant 0 : index
    %162 = vector.load %arg26[%c0_80, %c0_81] : memref<1x32xf32, #tpu.memory_space<vmem>>, vector<1x32xf32>
    %163 = vector.broadcast %162 : vector<1x32xf32> to vector<8x32xf32>
    %164 = arith.addf %161, %163 : vector<8x32xf32>
    %165 = arith.addf %128, %164 : vector<8x32xf32>
    %c0_82 = arith.constant 0 : index
    %c0_83 = arith.constant 0 : index
    %166 = vector.load %arg27[%c0_82, %c0_83] : memref<32x64xf32, #tpu.memory_space<vmem>>, vector<32x64xf32>
    %cst_84 = arith.constant dense<0.000000e+00> : vector<8x64xf32>
    %167 = tpu.matmul %165, %166, %cst_84 {dimension_numbers = #tpu.dot_dimension_numbers<[1], [0], [0], [1], [0, 0, 1, 1], [], []>} : vector<8x32xf32>, vector<32x64xf32>, vector<8x64xf32> -> vector<8x64xf32>
    %c0_85 = arith.constant 0 : index
    %c0_86 = arith.constant 0 : index
    %168 = vector.load %arg28[%c0_85, %c0_86] : memref<1x64xf32, #tpu.memory_space<vmem>>, vector<1x64xf32>
    %169 = vector.broadcast %168 : vector<1x64xf32> to vector<8x64xf32>
    %170 = arith.addf %167, %169 : vector<8x64xf32>
    %cst_87 = arith.constant 0.000000e+00 : f32
    %171 = vector.broadcast %cst_87 : f32 to vector<8x64xf32>
    %172 = arith.maximumf %170, %171 : vector<8x64xf32>
    %c0_88 = arith.constant 0 : index
    %c0_89 = arith.constant 0 : index
    %173 = vector.load %arg29[%c0_88, %c0_89] : memref<64x32xf32, #tpu.memory_space<vmem>>, vector<64x32xf32>
    %cst_90 = arith.constant dense<0.000000e+00> : vector<8x32xf32>
    %174 = tpu.matmul %172, %173, %cst_90 {dimension_numbers = #tpu.dot_dimension_numbers<[1], [0], [0], [1], [0, 0, 1, 1], [], []>} : vector<8x64xf32>, vector<64x32xf32>, vector<8x32xf32> -> vector<8x32xf32>
    %c0_91 = arith.constant 0 : index
    %c0_92 = arith.constant 0 : index
    %175 = vector.load %arg30[%c0_91, %c0_92] : memref<1x32xf32, #tpu.memory_space<vmem>>, vector<1x32xf32>
    %176 = vector.broadcast %175 : vector<1x32xf32> to vector<8x32xf32>
    %177 = arith.addf %174, %176 : vector<8x32xf32>
    %178 = arith.addf %165, %177 : vector<8x32xf32>
    %c0_93 = arith.constant 0 : index
    %c0_94 = arith.constant 0 : index
    %179 = vector.load %arg31[%c0_93, %c0_94] : memref<32x128xf32, #tpu.memory_space<vmem>>, vector<32x128xf32>
    %cst_95 = arith.constant dense<0.000000e+00> : vector<8x128xf32>
    %180 = tpu.matmul %178, %179, %cst_95 {dimension_numbers = #tpu.dot_dimension_numbers<[1], [0], [0], [1], [0, 0, 1, 1], [], []>} : vector<8x32xf32>, vector<32x128xf32>, vector<8x128xf32> -> vector<8x128xf32>
    %c0_96 = arith.constant 0 : index
    %c0_97 = arith.constant 0 : index
    %181 = vector.load %arg32[%c0_96, %c0_97] : memref<1x128xf32, #tpu.memory_space<vmem>>, vector<1x128xf32>
    %182 = vector.broadcast %181 : vector<1x128xf32> to vector<8x128xf32>
    %183 = arith.addf %180, %182 : vector<8x128xf32>
    %cst_98 = arith.constant dense<0xFF800000> : vector<8xf32>
    %184 = vector.multi_reduction <maximumf>, %183, %cst_98 [1] : vector<8x128xf32> to vector<8xf32>
    %185 = vector.shape_cast %184 : vector<8xf32> to vector<8x1xf32>
    %186 = vector.broadcast %185 : vector<8x1xf32> to vector<8x128xf32>
    %187 = arith.subf %183, %186 : vector<8x128xf32>
    %188 = math.exp %187 : vector<8x128xf32>
    %cst_99 = arith.constant dense<0.000000e+00> : vector<8xf32>
    %189 = vector.multi_reduction <add>, %188, %cst_99 [1] : vector<8x128xf32> to vector<8xf32>
    %190 = vector.shape_cast %189 : vector<8xf32> to vector<8x1xf32>
    %191 = vector.broadcast %190 : vector<8x1xf32> to vector<8x128xf32>
    %192 = arith.divf %188, %191 : vector<8x128xf32>
    %cst_100 = arith.constant dense<0.000000e+00> : vector<8x32xf32>
    %193 = tpu.matmul %158, %97, %cst_100 {dimension_numbers = #tpu.dot_dimension_numbers<[1], [0], [0], [1], [0, 0, 1, 1], [], []>} : vector<8x16xf32>, vector<16x32xf32>, vector<8x32xf32> -> vector<8x32xf32>
    %194 = tpu.concatenate %178, %193, %3 in 1 : vector<8x32xf32>, vector<8x32xf32>, vector<8x32xf32> -> vector<8x96xf32>
    %c0_101 = arith.constant 0 : index
    %c0_102 = arith.constant 0 : index
    %195 = vector.load %arg33[%c0_101, %c0_102] : memref<96x1xf32, #tpu.memory_space<vmem>>, vector<96x1xf32>
    %cst_103 = arith.constant dense<0.000000e+00> : vector<8x1xf32>
    %196 = tpu.matmul %194, %195, %cst_103 {dimension_numbers = #tpu.dot_dimension_numbers<[1], [0], [0], [1], [0, 0, 1, 1], [], []>} : vector<8x96xf32>, vector<96x1xf32>, vector<8x1xf32> -> vector<8x1xf32>
    %c0_104 = arith.constant 0 : index
    %c0_105 = arith.constant 0 : index
    %197 = vector.load %arg34[%c0_104, %c0_105] : memref<1x1xf32, #tpu.memory_space<vmem>>, vector<1x1xf32>
    %198 = vector.broadcast %197 : vector<1x1xf32> to vector<8x1xf32>
    %199 = arith.addf %196, %198 : vector<8x1xf32>
    %cst_106 = arith.constant 0.000000e+00 : f32
    %200 = vector.broadcast %cst_106 : f32 to vector<8x1xf32>
    %201 = arith.subf %200, %199 : vector<8x1xf32>
    %202 = math.exp %201 : vector<8x1xf32>
    %cst_107 = arith.constant 1.000000e+00 : f32
    %203 = vector.broadcast %cst_107 : f32 to vector<8x1xf32>
    %204 = arith.addf %203, %202 : vector<8x1xf32>
    %cst_108 = arith.constant 1.000000e+00 : f32
    %205 = vector.broadcast %cst_108 : f32 to vector<8x1xf32>
    %206 = arith.divf %205, %204 : vector<8x1xf32>
    %c0_109 = arith.constant 0 : index
    %c0_110 = arith.constant 0 : index
    %c0_111 = arith.constant 0 : index
    %207 = vector.load %arg7[%c0_109, %c0_110, %c0_111] : memref<1x1x16xf32, #tpu.memory_space<vmem>>, vector<1x1x16xf32>
    %208 = vector.shape_cast %207 : vector<1x1x16xf32> to vector<1x16xf32>
    %209 = vector.broadcast %208 : vector<1x16xf32> to vector<8x16xf32>
    %210 = arith.mulf %158, %209 : vector<8x16xf32>
    %cst_112 = arith.constant dense<0.000000e+00> : vector<8xf32>
    %211 = vector.multi_reduction <add>, %210, %cst_112 [1] : vector<8x16xf32> to vector<8xf32>
    %212 = vector.shape_cast %211 : vector<8xf32> to vector<8x1xf32>
    %cst_113 = arith.constant 9.99999971E-10 : f32
    %213 = vector.broadcast %cst_113 : f32 to vector<8x1xf32>
    %214 = arith.addf %212, %213 : vector<8x1xf32>
    %215 = vector.broadcast %214 : vector<8x1xf32> to vector<8x16xf32>
    %216 = arith.divf %210, %215 : vector<8x16xf32>
    %c0_114 = arith.constant 0 : index
    %c0_115 = arith.constant 0 : index
    %c0_116 = arith.constant 0 : index
    %217 = vector.load %arg6[%c0_114, %c0_115, %c0_116] : memref<1x16x1xi32, #tpu.memory_space<vmem>>, vector<1x16x1xi32>
    %218 = vector.shape_cast %217 : vector<1x16x1xi32> to vector<16x1xi32>
    %219 = tpu.iota {dimensions = array<i32: 1>} : vector<16x128xi32>
    %220 = vector.broadcast %218 : vector<16x1xi32> to vector<16x128xi32>
    %221 = arith.cmpi eq, %220, %219 : vector<16x128xi32>
    %222 = arith.extui %221 : vector<16x128xi1> to vector<16x128xi32>
    %223 = arith.sitofp %222 : vector<16x128xi32> to vector<16x128xf32>
    %cst_117 = arith.constant dense<0.000000e+00> : vector<8x128xf32>
    %224 = tpu.matmul %216, %223, %cst_117 {dimension_numbers = #tpu.dot_dimension_numbers<[1], [0], [0], [1], [0, 0, 1, 1], [], []>} : vector<8x16xf32>, vector<16x128xf32>, vector<8x128xf32> -> vector<8x128xf32>
    %225 = vector.broadcast %206 : vector<8x1xf32> to vector<8x128xf32>
    %226 = arith.mulf %225, %192 : vector<8x128xf32>
    %cst_118 = arith.constant 1.000000e+00 : f32
    %227 = vector.broadcast %cst_118 : f32 to vector<8x1xf32>
    %228 = arith.subf %227, %206 : vector<8x1xf32>
    %229 = vector.broadcast %228 : vector<8x1xf32> to vector<8x128xf32>
    %230 = arith.mulf %229, %224 : vector<8x128xf32>
    %231 = arith.addf %226, %230 : vector<8x128xf32>
    %c0_119 = arith.constant 0 : index
    %c0_120 = arith.constant 0 : index
    %c0_121 = arith.constant 0 : index
    %232 = vector.load %arg35[%c0_119, %c0_120, %c0_121] : memref<1x8x128xf32, #tpu.memory_space<vmem>>, vector<1x8x128xf32>
    %233 = vector.shape_cast %232 : vector<1x8x128xf32> to vector<8x128xf32>
    %234 = vector.shape_cast %231 : vector<8x128xf32> to vector<1x8x128xf32>
    tpu.vector_store %arg35[%c0_119, %c0_120, %c0_121], %234 {strides = array<i32>} : memref<1x8x128xf32, #tpu.memory_space<vmem>>, vector<1x8x128xf32>,
    return
  }
  func.func @transform_0(%arg0: i32) -> (i32, i32, i32) {
    %c0_i32 = arith.constant 0 : i32
    %c0_i32_0 = arith.constant 0 : i32
    %c0_i32_1 = arith.constant 0 : i32
    return %arg0, %c0_i32, %c0_i32_0 : i32, i32, i32
  }
  func.func @transform_1(%arg0: i32) -> (i32, i32, i32) {
    %c0_i32 = arith.constant 0 : i32
    %c0_i32_0 = arith.constant 0 : i32
    %c0_i32_1 = arith.constant 0 : i32
    return %arg0, %c0_i32, %c0_i32_0 : i32, i32, i32
  }
  func.func @transform_2(%arg0: i32) -> (i32, i32, i32) {
    %c0_i32 = arith.constant 0 : i32
    %c0_i32_0 = arith.constant 0 : i32
    %c0_i32_1 = arith.constant 0 : i32
    return %arg0, %c0_i32, %c0_i32_0 : i32, i32, i32
  }
  func.func @transform_3(%arg0: i32) -> (i32, i32, i32) {
    %c0_i32 = arith.constant 0 : i32
    %c0_i32_0 = arith.constant 0 : i32
    %c0_i32_1 = arith.constant 0 : i32
    return %arg0, %c0_i32, %c0_i32_0 : i32, i32, i32
  }
  func.func @transform_4(%arg0: i32) -> (i32, i32, i32) {
    %c0_i32 = arith.constant 0 : i32
    %c0_i32_0 = arith.constant 0 : i32
    %c0_i32_1 = arith.constant 0 : i32
    return %arg0, %c0_i32, %c0_i32_0 : i32, i32, i32
  }
  func.func @transform_5(%arg0: i32) -> (i32, i32, i32) {
    %c0_i32 = arith.constant 0 : i32
    %c0_i32_0 = arith.constant 0 : i32
    %c0_i32_1 = arith.constant 0 : i32
    return %arg0, %c0_i32, %c0_i32_0 : i32, i32, i32
  }
  func.func @transform_6(%arg0: i32) -> (i32, i32, i32) {
    %c0_i32 = arith.constant 0 : i32
    %c0_i32_0 = arith.constant 0 : i32
    %c0_i32_1 = arith.constant 0 : i32
    return %arg0, %c0_i32, %c0_i32_0 : i32, i32, i32
  }
  func.func @transform_7(%arg0: i32) -> i32 {
    %c0_i32 = arith.constant 0 : i32
    %c0_i32_0 = arith.constant 0 : i32
    return %c0_i32 : i32
  }
  func.func @transform_8(%arg0: i32) -> (i32, i32) {
    %c0_i32 = arith.constant 0 : i32
    %c0_i32_0 = arith.constant 0 : i32
    %c0_i32_1 = arith.constant 0 : i32
    return %c0_i32, %c0_i32_0 : i32, i32
  }
  func.func @transform_9(%arg0: i32) -> (i32, i32) {
    %c0_i32 = arith.constant 0 : i32
    %c0_i32_0 = arith.constant 0 : i32
    %c0_i32_1 = arith.constant 0 : i32
    return %c0_i32, %c0_i32_0 : i32, i32
  }
  func.func @transform_10(%arg0: i32) -> (i32, i32) {
    %c0_i32 = arith.constant 0 : i32
    %c0_i32_0 = arith.constant 0 : i32
    %c0_i32_1 = arith.constant 0 : i32
    return %c0_i32, %c0_i32_0 : i32, i32
  }
  func.func @transform_11(%arg0: i32) -> (i32, i32) {
    %c0_i32 = arith.constant 0 : i32
    %c0_i32_0 = arith.constant 0 : i32
    %c0_i32_1 = arith.constant 0 : i32
    return %c0_i32, %c0_i32_0 : i32, i32
  }
  func.func @transform_12(%arg0: i32) -> (i32, i32) {
    %c0_i32 = arith.constant 0 : i32
    %c0_i32_0 = arith.constant 0 : i32
    %c0_i32_1 = arith.constant 0 : i32
    return %c0_i32, %c0_i32_0 : i32, i32
  }
  func.func @transform_13(%arg0: i32) -> (i32, i32) {
    %c0_i32 = arith.constant 0 : i32
    %c0_i32_0 = arith.constant 0 : i32
    %c0_i32_1 = arith.constant 0 : i32
    return %c0_i32, %c0_i32_0 : i32, i32
  }
  func.func @transform_14(%arg0: i32) -> (i32, i32) {
    %c0_i32 = arith.constant 0 : i32
    %c0_i32_0 = arith.constant 0 : i32
    %c0_i32_1 = arith.constant 0 : i32
    return %c0_i32, %c0_i32_0 : i32, i32
  }
  func.func @transform_15(%arg0: i32) -> (i32, i32) {
    %c0_i32 = arith.constant 0 : i32
    %c0_i32_0 = arith.constant 0 : i32
    %c0_i32_1 = arith.constant 0 : i32
    return %c0_i32, %c0_i32_0 : i32, i32
  }
  func.func @transform_16(%arg0: i32) -> (i32, i32) {
    %c0_i32 = arith.constant 0 : i32
    %c0_i32_0 = arith.constant 0 : i32
    %c0_i32_1 = arith.constant 0 : i32
    return %c0_i32, %c0_i32_0 : i32, i32
  }
  func.func @transform_17(%arg0: i32) -> (i32, i32) {
    %c0_i32 = arith.constant 0 : i32
    %c0_i32_0 = arith.constant 0 : i32
    %c0_i32_1 = arith.constant 0 : i32
    return %c0_i32, %c0_i32_0 : i32, i32
  }
  func.func @transform_18(%arg0: i32) -> (i32, i32) {
    %c0_i32 = arith.constant 0 : i32
    %c0_i32_0 = arith.constant 0 : i32
    %c0_i32_1 = arith.constant 0 : i32
    return %c0_i32, %c0_i32_0 : i32, i32
  }
  func.func @transform_19(%arg0: i32) -> (i32, i32) {
    %c0_i32 = arith.constant 0 : i32
    %c0_i32_0 = arith.constant 0 : i32
    %c0_i32_1 = arith.constant 0 : i32
    return %c0_i32, %c0_i32_0 : i32, i32
  }
  func.func @transform_20(%arg0: i32) -> (i32, i32) {
    %c0_i32 = arith.constant 0 : i32
    %c0_i32_0 = arith.constant 0 : i32
    %c0_i32_1 = arith.constant 0 : i32
    return %c0_i32, %c0_i32_0 : i32, i32
  }
  func.func @transform_21(%arg0: i32) -> (i32, i32) {
    %c0_i32 = arith.constant 0 : i32
    %c0_i32_0 = arith.constant 0 : i32
    %c0_i32_1 = arith.constant 0 : i32
    return %c0_i32, %c0_i32_0 : i32, i32
  }
  func.func @transform_22(%arg0: i32) -> (i32, i32) {
    %c0_i32 = arith.constant 0 : i32
    %c0_i32_0 = arith.constant 0 : i32
    %c0_i32_1 = arith.constant 0 : i32
    return %c0_i32, %c0_i32_0 : i32, i32
  }
  func.func @transform_23(%arg0: i32) -> (i32, i32) {
    %c0_i32 = arith.constant 0 : i32
    %c0_i32_0 = arith.constant 0 : i32
    %c0_i32_1 = arith.constant 0 : i32
    return %c0_i32, %c0_i32_0 : i32, i32
  }
  func.func @transform_24(%arg0: i32) -> (i32, i32) {
    %c0_i32 = arith.constant 0 : i32
    %c0_i32_0 = arith.constant 0 : i32
    %c0_i32_1 = arith.constant 0 : i32
    return %c0_i32, %c0_i32_0 : i32, i32
  }
  func.func @transform_25(%arg0: i32) -> (i32, i32) {
    %c0_i32 = arith.constant 0 : i32
    %c0_i32_0 = arith.constant 0 : i32
    %c0_i32_1 = arith.constant 0 : i32
    return %c0_i32, %c0_i32_0 : i32, i32
  }
  func.func @transform_26(%arg0: i32) -> (i32, i32) {
    %c0_i32 = arith.constant 0 : i32
    %c0_i32_0 = arith.constant 0 : i32
    %c0_i32_1 = arith.constant 0 : i32
    return %c0_i32, %c0_i32_0 : i32, i32
  }
  func.func @transform_27(%arg0: i32) -> (i32, i32) {
    %c0_i32 = arith.constant 0 : i32
    %c0_i32_0 = arith.constant 0 : i32
    %c0_i32_1 = arith.constant 0 : i32
    return %c0_i32, %c0_i32_0 : i32, i32
  }
  func.func @transform_28(%arg0: i32) -> (i32, i32) {
    %c0_i32 = arith.constant 0 : i32
    %c0_i32_0 = arith.constant 0 : i32
    %c0_i32_1 = arith.constant 0 : i32
    return %c0_i32, %c0_i32_0 : i32, i32
  }
  func.func @transform_29(%arg0: i32) -> (i32, i32) {
    %c0_i32 = arith.constant 0 : i32
    %c0_i32_0 = arith.constant 0 : i32
    %c0_i32_1 = arith.constant 0 : i32
    return %c0_i32, %c0_i32_0 : i32, i32
  }
  func.func @transform_30(%arg0: i32) -> (i32, i32) {
    %c0_i32 = arith.constant 0 : i32
    %c0_i32_0 = arith.constant 0 : i32
    %c0_i32_1 = arith.constant 0 : i32
    return %c0_i32, %c0_i32_0 : i32, i32
  }
  func.func @transform_31(%arg0: i32) -> (i32, i32) {
    %c0_i32 = arith.constant 0 : i32
    %c0_i32_0 = arith.constant 0 : i32
    %c0_i32_1 = arith.constant 0 : i32
    return %c0_i32, %c0_i32_0 : i32, i32
  }
  func.func @transform_32(%arg0: i32) -> (i32, i32) {
    %c0_i32 = arith.constant 0 : i32
    %c0_i32_0 = arith.constant 0 : i32
    %c0_i32_1 = arith.constant 0 : i32
    return %c0_i32, %c0_i32_0 : i32, i32
  }
  func.func @transform_33(%arg0: i32) -> (i32, i32) {
    %c0_i32 = arith.constant 0 : i32
    %c0_i32_0 = arith.constant 0 : i32
    %c0_i32_1 = arith.constant 0 : i32
    return %c0_i32, %c0_i32_0 : i32, i32
  }
  func.func @transform_34(%arg0: i32) -> (i32, i32, i32) {
    %c0_i32 = arith.constant 0 : i32
    %c0_i32_0 = arith.constant 0 : i32
    %c0_i32_1 = arith.constant 0 : i32
    return %arg0, %c0_i32, %c0_i32_0 : i32, i32, i32
  }
}

</mosaic_0001>

<bundles_post_ra>
// kernel: tpu_custom_call.1
= control target key start
LH: loop header
LB: loop body
LE: loop exit
PB: predicated region body
PF: predicated region fallthrough
CT: control target
= control target key end

     0   :  { %s4584_s6 = smov 1   ;;  %s4585_s10 = smov 2   ;;  %s5372_s0 = inlined_call_operand.smem [shape: u32[35], index: -1, kind: input, shape index: {}] }
   0x1   :  { %s4647_s5 = sld [smem:[%s5372_s0]]   ;;  %s4586_s14 = smov 3  }
   0x2   :  { %s4652_s9 = sld [smem:[%s5372_s0 + %s4584_s6]]   ;;  %s4587_s18 = smov 4  }
   0x3   :  { %s4657_s13 = sld [smem:[%s5372_s0 + %s4585_s10]]   ;;  %s4588_s22 = smov 5  }
   0x4   :  { %s4662_s17 = sld [smem:[%s5372_s0 + %s4586_s14]]   ;;  %s4589_s26 = smov 6  }
   0x5   :  { %s4667_s21 = sld [smem:[%s5372_s0 + %s4587_s18]]   ;;  %s4590_s30 = smov 7  }
   0x6   :  { %s4672_s25 = sld [smem:[%s5372_s0 + %s4588_s22]]   ;;  %s4591_s4 = smov 8  }
   0x7   :  { %5392 = sst [smem:[#allocation32_spill]] %s4647_s5  ;;  %s4592_s10 = smov 9  }
   0x8   :  { %5393 = sst [smem:[#allocation33_spill]] %s4652_s9  ;;  %s4593_s15 = smov 10  }
   0x9   :  { %5394 = sst [smem:[#allocation34_spill]] %s4657_s13  ;;  %s4594_s20 = smov 11  }
   0xa   :  { %s4677_s29 = sld [smem:[%s5372_s0 + %s4589_s26]]   ;;  %s4595_s26 = smov 12  }
   0xb   :  { %s4682_s3 = sld [smem:[%s5372_s0 + %s4590_s30]]   ;;  %s4596_s1 = smov 13  }
   0xc   :  { %5395 = sst [smem:[#allocation35_spill]] %s4672_s25  ;;  %s4597_s7 = smov 14  }
   0xd   :  { %s4687_s8 = sld [smem:[%s5372_s0 + %s4591_s4]]   ;;  %s4599_s22 = smov 16  }
   0xe   :  { %s4692_s14 = sld [smem:[%s5372_s0 + %s4592_s10]]   ;;  %s4600_s28 = smov 17  }
   0xf   :  { %s4697_s19 = sld [smem:[%s5372_s0 + %s4593_s15]]   ;;  %s4598_s15 = smov 15  }
  0x10   :  { %5396 = sst [smem:[#allocation36_spill]] %s4677_s29  ;;  %s4617_s10 = smov 34  }
  0x11   :  { %5397 = sst [smem:[#allocation37_spill]] %s4682_s3 }
  0x12   :  { %s4702_s24 = sld [smem:[%s5372_s0 + %s4594_s20]]  }
  0x13   :  { %5398 = sst [smem:[#allocation38_spill]] %s4687_s8 }
  0x14   :  { %5399 = sst [smem:[#allocation39_spill]] %s4692_s14 }
  0x15   :  { %5400 = sst [smem:[#allocation40_spill]] %s4697_s19 }
  0x16   :  { %s4707_s30 = sld [smem:[%s5372_s0 + %s4595_s26]]  }
  0x17   :  { %s4712_s6 = sld [smem:[%s5372_s0 + %s4596_s1]]  }
  0x18   :  { %5401 = sst [smem:[#allocation41_spill]] %s4702_s24 }
  0x19   :  { %s4717_s12 = sld [smem:[%s5372_s0 + %s4597_s7]]   ;;  %s4601_s7 = smov 18  }
  0x1a   :  { %s4722_s20 = sld [smem:[%s5372_s0 + %s4598_s15]]   ;;  %s4602_s15 = smov 19  }
  0x1b   :  { %s4727_s27 = sld [smem:[%s5372_s0 + %s4599_s22]]   ;;  %s4603_s22 = smov 20  }
  0x1c   :  { %5402 = sst [smem:[#allocation42_spill]] %s4707_s30 }
  0x1d   :  { %5403 = sst [smem:[#allocation43_spill]] %s4712_s6 }
  0x1e   :  { %s4732_s4 = sld [smem:[%s5372_s0 + %s4600_s28]]   ;;  %s4604_s28 = smov 21  }
  0x1f   :  { %5404 = sst [smem:[#allocation44_spill]] %s4717_s12 }
  0x20   :  { %5405 = sst [smem:[#allocation45_spill]] %s4722_s20 }
  0x21   :  { %5406 = sst [smem:[#allocation46_spill]] %s4727_s27 }
  0x22   :  { %s4737_s25 = sld [smem:[%s5372_s0 + %s4601_s7]]   ;;  %s4605_s7 = smov 22  }
  0x23   :  { %s4742_s29 = sld [smem:[%s5372_s0 + %s4602_s15]]   ;;  %s4606_s15 = smov 23  }
  0x24   :  { %5407 = sst [smem:[#allocation47_spill]] %s4732_s4 }
  0x25   :  { %s4747_s27 = sld [smem:[%s5372_s0 + %s4603_s22]]   ;;  %s4607_s22 = smov 24  }
  0x26   :  { %s4752_s12 = sld [smem:[%s5372_s0 + %s4604_s28]]   ;;  %s4608_s28 = smov 25  }
  0x27   :  { %s4815_s13 = sld [smem:[%s5372_s0 + %s4617_s10]]  }
  0x28   :  { %5408 = sst [smem:[#allocation48_spill]] %s4737_s25 }
  0x29   :  { %5409 = sst [smem:[#allocation49_spill]] %s4742_s29 }
  0x2a   :  { %s4757_s25 = sld [smem:[%s5372_s0 + %s4605_s7]]   ;;  %s4609_s7 = smov 26  }
  0x2b   :  { %5410 = sst [smem:[#allocation50_spill]] %s4747_s27 }
  0x2c   :  { %5411 = sst [smem:[#allocation51_spill]] %s4752_s12 }
  0x2d   :  { %s4762_s29 = sld [smem:[%s5372_s0 + %s4606_s15]]   ;;  %s4610_s15 = smov 27  }
  0x2e   :  { %s4767_s27 = sld [smem:[%s5372_s0 + %s4607_s22]]   ;;  %s4611_s22 = smov 28  }
  0x2f   :  { %s4772_s12 = sld [smem:[%s5372_s0 + %s4608_s28]]   ;;  %s4612_s28 = smov 29  }
  0x30   :  { %5412 = sst [smem:[#allocation52_spill]] %s4757_s25 }
  0x31   :  { %s4777_s25 = sld [smem:[%s5372_s0 + %s4609_s7]]   ;;  %s4613_s7 = smov 30  }
  0x32   :  { %s4787_s30 = sld [smem:[%s5372_s0 + %s4611_s22]]   ;;  %s4615_s22 = smov 32  }
  0x33   :  { %5413 = sst [smem:[#allocation53_spill]] %s4762_s29 }
  0x34   :  { %s4782_s29 = sld [smem:[%s5372_s0 + %s4610_s15]]   ;;  %s4614_s15 = smov 31  }
  0x35   :  { %5414 = sst [smem:[#allocation54_spill]] %s4772_s12 }
  0x36   :  { %s4792_s12 = sld [smem:[%s5372_s0 + %s4612_s28]]   ;;  %s4616_s28 = smov 33  }
  0x37   :  { %s4797_s19 = sld [smem:[%s5372_s0 + %s4613_s7]]  }
  0x38   :  { %5416 = sst [smem:[#allocation56_spill]] %s4787_s30 }
  0x39   :  { %s4807_s30 = sld [smem:[%s5372_s0 + %s4615_s22]]  }
  0x3a   :  { %5415 = sst [smem:[#allocation55_spill]] %s4782_s29 }
  0x3b   :  { %s4802_s29 = sld [smem:[%s5372_s0 + %s4614_s15]]  }
  0x3c   :  { %5417 = sst [smem:[#allocation57_spill]] %s4792_s12 }
  0x3d   :  { %5418 = sst [smem:[#allocation58_spill]] %s4797_s19 }
  0x3e   :  { %s3562_s12 = sld [smem:[%s5372_s0 + %s4616_s28]]  }
  0x3f   :  { %5420 = sst [smem:[#allocation60_spill]] %s4815_s13 }
  0x41   :  { %5419 = sst [smem:[#allocation59_spill]] %s4802_s29 }
  0x44   :  { %v74_v0 = vstv %s3562_s12 }
  0x45   :  { %75 = vst [vmem:[#allocation2] sm:$0x1] %v74_v0 }
  0x46   :  { %76 = vsyncpa [#allocation4], 0 }
  0x47   :  { %78 = vsyncpa [#allocation4 + $0x1], 0 }
  0x48   :  { %79 = vsyncpa [#allocation8], 0 }
  0x49   :  { %81 = vsyncpa [#allocation8 + $0x1], 0 }
  0x4a   :  { %82 = vsyncpa [#allocation6], 0 }
  0x4b   :  { %83 = vsyncpa [#allocation12], 0 }
  0x4c   :  { %84 = vsyncpa [#allocation15], 0 }
  0x4d   :  { %85 = vsyncpa [#allocation18], 0 }
  0x4e   :  { %86 = vsyncpa [#allocation21], 0 }
  0x4f   :  { %87 = vsyncpa [#allocation5], 0 }
  0x50   :  { %89 = vsyncpa [#allocation5 + $0x1], 0  ;;  %s4817_s15 = smov 0   ;;  %s4819_s16 = smov 0  }
  0x51   :  { %s4821_s18 = smov 0   ;;  %s4823_s0 = smov 0  }
  0x52 LB: > { %s5421_s8 = sld [smem:[#allocation38_spill]]  ;;  %s4618_s12 = smov [#allocation10]   ;;  %s4574_s16 = sphi %s4819_s16, %s5477_s16   ;;  %s4570_s15 = sphi %s4817_s15, %s5476_s15   ;;  %s4582_s0 = sphi %s4823_s0, %s5479_s0   ;;  %s4578_s18 = sphi %s4821_s18, %s5478_s18  }
  0x53   : > { %s5422_s9 = sld [smem:[#allocation33_spill]]  ;;  %s900_s22 = sshll.u32 %s4618_s12, 4  ;;  %s901_s22 = int_to_ptr.vmem [resolvable:$true] %s900_s22 }
  0x54   : > { %s4838_s23 = sadd.s32 4294967295, %s4582_s0   ;;  %p3566_p0 = scmp.ge.s32.totalorder %s4582_s0, 1 }
  0x55   : > { %p5382_p1 = scmp.eq.s32.totalorder %s4838_s23, 0  ;;  %p875_p2 = scmp.lt.s32.totalorder %s4582_s0, 3 }
  0x56   : > { %s4619_s28 = smov [#allocation11]   ;;  %s4620_s2 = smov [#allocation14]  }
  0x57   : > { %p4843_p3 = pnand %p3566_p0, %p875_p2  ;;  %s914_s1 = sshll.u32 %s4619_s28, 4  ;;  %s4850_s1 = int_to_ptr.vmem [resolvable:$true] %s914_s1 }
  0x58   : > { %s942_s10 = sshll.u32 %s4620_s2, 4  ;;  %s4621_s11 = smov [#allocation17]   ;;  %s4858_s10 = int_to_ptr.vmem [resolvable:$true] %s942_s10 }
  0x59   : > { %s5423_s26 = scalar_select %p4843_p3, 1, 0 }
  0x5a   : > { %p4044_p5 = pneg %p4843_p3  ;;  %s4860_s12 = sshll.u32 %s4621_s11, 4  ;;  %s985_s12 = int_to_ptr.vmem [resolvable:$true] %s4860_s12 }
  0x5b   : > { %s4226_s28 = scalar_lea.vmem %s901_s22, 16  ;;  %s4233_s2 = scalar_lea.vmem %s901_s22, 32 }
  0x5c   : > { %p4854_p6 = pnand %p4044_p5, %p5382_p1  ;;  %p4227_p8 = scmp.ne.s32.totalorder %s901_s22, %s4226_s28 }
  0x5d   : > { %p4234_p11 = scmp.lt.s32.totalorder %s901_s22, %s901_s22  ;;  %p4235_p12 = scmp.lt.s32.totalorder %s4233_s2, %s4226_s28 }
  0x5e   : > { %p4864_p7 = pneg %p4854_p6 }
  0x5f   : > { %p4236_p13 = por %p4235_p12, %p4234_p11 }
  0x60   : > { %p4229_p9 = pnand %p4227_p8, %p4864_p7 }
  0x62   : > { %p4230_p10 = pneg %p4229_p9 }
  0x64   : > { %p4237_p0 = pnand %p4236_p13, %p4230_p10 }
  0x66   : > { %4240 = shalt.err (!%p4237_p0)
}
  0x67   : > { %s5426_s14 = sld [smem:[#allocation39_spill]]  ;;  %s4252_s11 = scalar_lea.vmem %s4850_s1, 16 }
  0x68   : > { %p4253_p2 = scmp.ne.s32.totalorder %s4850_s1, %s4252_s11  ;;  %s4259_s29 = scalar_lea.vmem %s4850_s1, 32 }
  0x69   : > { %p4260_p9 = scmp.lt.s32.totalorder %s4850_s1, %s4850_s1  ;;  %p4261_p11 = scmp.lt.s32.totalorder %s4259_s29, %s4252_s11 }
  0x6a   : > { %p4255_p5 = pnand %p4253_p2, %p4864_p7 }
  0x6b   : > { %p4262_p10 = por %p4261_p11, %p4260_p9 }
  0x6c   : > { %p4256_p8 = pneg %p4255_p5 }
  0x6d   : > { %4050 = dma.hbm_to_vmem [thread:$0]  (!%p4854_p6), %s5426_s14, 16, %s901_s22, [#allocation8]  }
  0x6e   : > { %p4263_p12 = pnand %p4262_p10, %p4256_p8 }
  0x70   : > { %4266 = shalt.err (!%p4263_p12)
}
  0x71   : > { %s5427_s24 = sld [smem:[#allocation41_spill]]  ;;  %s4278_s22 = scalar_lea.vmem %s4858_s10, 16 }
  0x72   : > { %p4279_p13 = scmp.ne.s32.totalorder %s4858_s10, %s4278_s22  ;;  %s4285_s28 = scalar_lea.vmem %s4858_s10, 32 }
  0x73   : > { %p4286_p5 = scmp.lt.s32.totalorder %s4858_s10, %s4858_s10  ;;  %p4287_p8 = scmp.lt.s32.totalorder %s4285_s28, %s4278_s22 }
  0x74   : > { %p4281_p0 = pnand %p4279_p13, %p4864_p7 }
  0x75   : > { %p4288_p9 = por %p4287_p8, %p4286_p5 }
  0x76   : > { %p4282_p2 = pneg %p4281_p0 }
  0x77   : > { %4053 = dma.hbm_to_vmem [thread:$0]  (!%p4854_p6), %s5427_s24, 16, %s4850_s1, [#allocation12]  }
  0x78   : > { %p4289_p11 = pnand %p4288_p9, %p4282_p2 }
  0x7a   : > { %4292 = shalt.err (!%p4289_p11)
}
  0x7b   : > { %s5428_s20 = sld [smem:[#allocation45_spill]]  ;;  %s4304_s29 = scalar_lea.vmem %s985_s12, 512 }
  0x7c   : > { %p4305_p10 = scmp.ne.s32.totalorder %s985_s12, %s4304_s29  ;;  %p4312_p0 = scmp.lt.s32.totalorder %s985_s12, %s985_s12 }
  0x7d   : > { %p4313_p4 = scmp.lt.s32.totalorder %s4304_s29, %s4304_s29 }
  0x7e   : > { %p4307_p12 = pnand %p4305_p10, %p4864_p7 }
  0x7f   : > { %p4314_p1 = por %p4313_p4, %p4312_p0 }
  0x80   : > { %p4308_p13 = pneg %p4307_p12 }
  0x81   : > { %4059 = dma.hbm_to_vmem [thread:$0]  (!%p4854_p6), %s5428_s20, 16, %s4858_s10, [#allocation15]  }
  0x82   : > { %p4315_p3 = pnand %p4314_p1, %p4308_p13 }
  0x84   : > { %4318 = shalt.err (!%p4315_p3)
}
  0x85   : > { %s4622_s1 = smov 128   ;;  %s5429_s3 = sld [smem:[#allocation37_spill]] }
  0x86   : > { %s4623_s2 = smov 8   ;;  %s4624_s10 = smov [#allocation9]  }
  0x87   : > { %4065 = dma.hbm_to_vmem [thread:$0]  (!%p4854_p6), %s4767_s27, 512, %s985_s12, [#allocation18], %s4622_s1, %s4622_s1, %s4623_s2  }
  0x88   : > { %s4625_s11 = smov [#allocation13]   ;;  %s4626_s28 = smov [#allocation16]  }
  0x89   : > { %s928_s22 = sshll.u32 %s4625_s11, 4  ;;  %s956_s29 = sshll.u32 %s4626_s28, 4  ;;  %s929_s22 = int_to_ptr.vmem [resolvable:$true] %s928_s22  ;;  %s957_s29 = int_to_ptr.vmem [resolvable:$true] %s956_s29 }
  0x8a   : > { %s4341_s14 = scalar_lea.vmem %s929_s22, 16  ;;  %s4348_s20 = scalar_lea.vmem %s929_s22, 32 }
  0x8b   : > { %4047 = dma.hbm_to_smem (!%p4854_p6), %s5429_s3, 16, %s4624_s10, [#allocation6]  }
  0x8c   : > { %p4342_p1 = scmp.ne.s32.totalorder %s929_s22, %s4341_s14  ;;  %p4349_p2 = scmp.lt.s32.totalorder %s929_s22, %s929_s22 }
  0x8d   : > { %p4350_p5 = scmp.lt.s32.totalorder %s4348_s20, %s4341_s14 }
  0x8e   : > { %p4344_p3 = pnand %p4342_p1, %p4864_p7 }
  0x8f   : > { %p4351_p8 = por %p4350_p5, %p4349_p2 }
  0x90   : > { %p4345_p4 = pneg %p4344_p3 }
  0x92   : > { %p4352_p9 = pnand %p4351_p8, %p4345_p4 }
  0x94   : > { %4355 = shalt.err (!%p4352_p9)
}
  0x95   : > { %s5430_s6 = sld [smem:[#allocation43_spill]]  ;;  %s4367_s12 = scalar_lea.vmem %s957_s29, 16 }
  0x96   : > { %p4368_p11 = scmp.ne.s32.totalorder %s957_s29, %s4367_s12  ;;  %s4374_s10 = scalar_lea.vmem %s957_s29, 32 }
  0x97   : > { %p4375_p13 = scmp.lt.s32.totalorder %s957_s29, %s957_s29  ;;  %p4376_p0 = scmp.lt.s32.totalorder %s4374_s10, %s4367_s12 }
  0x98   : > { %p4370_p10 = pnand %p4368_p11, %p4864_p7 }
  0x99   : > { %p4377_p1 = por %p4376_p0, %p4375_p13 }
  0x9a   : > { %p4371_p12 = pneg %p4370_p10 }
  0x9b   : > { %4056 = dma.hbm_to_vmem [thread:$0]  (!%p4854_p6), %s5430_s6, 16, %s929_s22, [#allocation12]  }
  0x9c   : > { %p4378_p3 = pnand %p4377_p1, %p4371_p12 }
  0x9e   : > { %4381 = shalt.err (!%p4378_p3)
}
  0x9f   : > { %s5431_s4 = sld [smem:[#allocation47_spill]]  ;;  %s4627_s14 = smov [#allocation19]  }
  0xa0   : > { %s1000_s20 = sshll.u32 %s4627_s14, 4  ;;  %s4628_s11 = smov [#allocation20]   ;;  %s1001_s20 = int_to_ptr.vmem [resolvable:$true] %s1000_s20 }
  0xa1   : > { %s1022_s22 = sshll.u32 %s4628_s11, 4  ;;  %s4393_s28 = scalar_lea.vmem %s1001_s20, 512  ;;  %s1023_s22 = int_to_ptr.vmem [resolvable:$true] %s1022_s22 }
  0xa2   : > { %p4394_p4 = scmp.ne.s32.totalorder %s1001_s20, %s4393_s28  ;;  %p4401_p8 = scmp.lt.s32.totalorder %s1001_s20, %s1001_s20 }
  0xa3   : > { %p4402_p9 = scmp.lt.s32.totalorder %s4393_s28, %s4393_s28 }
  0xa4   : > { %p4396_p2 = pnand %p4394_p4, %p4864_p7 }
  0xa5   : > { %4062 = dma.hbm_to_vmem [thread:$0]  (!%p4854_p6), %s5431_s4, 16, %s957_s29, [#allocation15]  }
  0xa6   : > { %p4397_p5 = pneg %p4396_p2  ;;  %p4403_p11 = por %p4402_p9, %p4401_p8 }
  0xa8   : > { %p4404_p10 = pnand %p4403_p11, %p4397_p5 }
  0xaa   : > { %4407 = shalt.err (!%p4404_p10)
}
  0xab   : > { %4068 = dma.hbm_to_vmem [thread:$0]  (!%p4854_p6), %s4777_s25, 512, %s1001_s20, [#allocation18], %s4622_s1, %s4622_s1, %s4623_s2  }
  0xac   : > { %s4419_s29 = scalar_lea.vmem %s1023_s22, 512  ;;  %p4427_p1 = scmp.lt.s32.totalorder %s1023_s22, %s1023_s22 }
  0xad   : > { %p4420_p12 = scmp.ne.s32.totalorder %s1023_s22, %s4419_s29  ;;  %p4428_p3 = scmp.lt.s32.totalorder %s4419_s29, %s4419_s29 }
  0xaf   : > { %p4422_p13 = pnand %p4420_p12, %p4864_p7  ;;  %p4429_p4 = por %p4428_p3, %p4427_p1 }
  0xb1   : > { %p4423_p0 = pneg %p4422_p13 }
  0xb3   : > { %p4430_p2 = pnand %p4429_p4, %p4423_p0 }
  0xb5   : > { %4433 = shalt.err (!%p4430_p2)
}
  0xb6   : > { %s5432_s19 = sld [smem:[#allocation58_spill]]  ;;  %s3565_s13 = sadd.s32 4294967294, %s4582_s0  }
  0xb7   : > { %s4935_s7 = sadd.s32 1, %s4582_s0   ;;  %s128_s12 = sadd.s32 1, %s4578_s18 }
  0xb8   : > { %s125_s10 = ssub.s32 %s4582_s0, %s4935_s7  ;;  %p135_p7 = scmp.ne.s32.totalorder %s4578_s18, %s4574_s16 }
  0xb9   : > { %p126_p5 = scmp.eq.s32.totalorder %s125_s10, 0  ;;  %p136_p8 = scmp.eq.s32.totalorder %s4582_s0, 0 }
  0xba   : > { %p141_p9 = scmp.ne.s32.totalorder %s4574_s16, %s4570_s15  ;;  %p862_p11 = scmp.eq.s32.totalorder %s4838_s23, 1 }
  0xbb   : > { %s4947_s14 = scalar_select %p126_p5, %s4578_s18, %s128_s12  }
  0xbc   : > { %4071 = dma.hbm_to_vmem [thread:$0]  (!%p4854_p6), %s5432_s19, 512, %s1023_s22, [#allocation21], %s4622_s1, %s4622_s1, %s4623_s2  }
  0xbd   : > { %p137_p10 = por %p136_p8, %p135_p7  ;;  %p5433_p12 = scmp.eq.s32.totalorder %s4838_s23, 0 }
  0xbe   : > { %p4955_p13 = por %p862_p11, %p135_p7  ;;  %p868_p0 = scmp.eq.s32.totalorder %s3565_s13, 1 }
  0xbf   : > { %p4951_p6 = por %p5433_p12, %p141_p9  ;;  %p4092_p1 = scmp.lt.s32.totalorder %s4582_s0, 2 }
  0xc0   : > { %s5435_s2 = scalar_select %p4955_p13, 1, 0 }
  0xc1   : > { %s5434_s1 = scalar_select %p4951_p6, 1, 0 }
  0xc2   : > { %s1053_s20 = sand.u32 1, %s4578_s18   ;;  %p4961_p3 = por %p868_p0, %p141_p9 }
  0xc3   : > { %s4965_s22 = sshll.u32 %s1053_s20, 3  ;;  %s3578_s28 = sshll.u32 %s4582_s0, 7 }
  0xc4   : > { %s5436_s11 = scalar_select %p4961_p3, 1, 0 }
  0xc5   : > { %s4969_s29 = scalar_lea.hbm %s5422_s9, %s3578_s28  ;;  %s1057_s12 = scalar_lea.vmem [#allocation3], %s4965_s22 }
  0xc6   : > { %s1064_s10 = sshll.u32 %s1057_s12, 4  ;;  %p4972_p4 = pnand %p4092_p1, %p137_p10  ;;  %s1065_s10 = int_to_ptr.vmem [resolvable:$true] %s1064_s10 }
  0xc7   : > { %s4977_s3 = scalar_lea.hbm %s4662_s17, %s3578_s28  ;;  %s1054_s4 = scalar_lea.sflag [#allocation4], %s1053_s20 }
  0xc8   : > { %s4434_s6 = scalar_lea.hbm %s4969_s29, 128  ;;  %p4436_p7 = pneg %p4972_p4 }
  0xc9   : > { %p4435_p2 = scmp.ne.s32.totalorder %s4969_s29, %s4434_s6  ;;  %s4439_s19 = scalar_lea.hbm %s5422_s9, 256 }
  0xca   : > { %p4440_p9 = scmp.lt.s32.totalorder %s4969_s29, %s5422_s9  ;;  %p4441_p11 = scmp.lt.s32.totalorder %s4439_s19, %s4434_s6 }
  0xcb   : > { %p4437_p5 = pnand %p4436_p7, %p4435_p2 }
  0xcc   : > { %p4442_p10 = por %p4441_p11, %p4440_p9 }
  0xcd   : > { %p4438_p8 = pneg %p4437_p5 }
  0xcf   : > { %p4443_p12 = pnand %p4442_p10, %p4438_p8 }
  0xd1   : > { %4446 = shalt.err (!%p4443_p12)
}
  0xd2   : > { %s4447_s12 = scalar_lea.vmem %s1065_s10, 128  ;;  %s4629_s20 = smov [#allocation3]  }
  0xd3   : > { %p4448_p0 = scmp.ne.s32.totalorder %s1065_s10, %s4447_s12  ;;  %s4452_s28 = sshll.u32 %s4629_s20, 4  ;;  %s4453_s28 = int_to_ptr.vmem [resolvable:$false] %s4452_s28 }
  0xd4   : > { %s4454_s24 = scalar_lea.vmem %s4453_s28, 256  ;;  %p4455_p13 = scmp.lt.s32.totalorder %s1065_s10, %s4453_s28 }
  0xd5   : > { %p4450_p1 = pnand %p4448_p0, %p4436_p7  ;;  %p4456_p2 = scmp.lt.s32.totalorder %s4454_s24, %s4447_s12 }
  0xd7   : > { %p4451_p3 = pneg %p4450_p1  ;;  %p4457_p5 = por %p4456_p2, %p4455_p13 }
  0xd9   : > { %p4458_p6 = pnand %p4457_p5, %p4451_p3 }
  0xdb   : > { %4461 = shalt.err (!%p4458_p6)
}
  0xdc   : > { %4075 = dma.hbm_to_vmem [thread:$0]  (!%p4972_p4), %s4969_s29, 128, %s1065_s10, %s1054_s4  }
  0xdd   : > { %s1077_s19 = sand.u32 1, %s4582_s0   ;;  %s1081_s6 = scalar_lea.vmem [#allocation7], %s4965_s22 }
  0xde   : > { %s1088_s20 = sshll.u32 %s1081_s6, 4  ;;  %s1078_s24 = scalar_lea.sflag [#allocation8], %s1077_s19  ;;  %s1089_s20 = int_to_ptr.vmem [resolvable:$true] %s1088_s20 }
  0xdf   : > { %s4462_s12 = scalar_lea.hbm %s4977_s3, 128  ;;  %s4467_s28 = scalar_lea.hbm %s4662_s17, 256 }
  0xe0   : > { %p4463_p13 = scmp.ne.s32.totalorder %s4977_s3, %s4462_s12  ;;  %p4468_p8 = scmp.lt.s32.totalorder %s4977_s3, %s4662_s17 }
  0xe1   : > { %p4469_p9 = scmp.lt.s32.totalorder %s4467_s28, %s4462_s12 }
  0xe2   : > { %p4465_p6 = pnand %p4463_p13, %p4436_p7 }
  0xe3   : > { %p4470_p11 = por %p4469_p9, %p4468_p8 }
  0xe4   : > { %p4466_p3 = pneg %p4465_p6 }
  0xe6   : > { %p4471_p10 = pnand %p4470_p11, %p4466_p3 }
  0xe8   : > { %4474 = shalt.err (!%p4471_p10)
}
  0xe9   : > { %s4475_s9 = scalar_lea.vmem %s1089_s20, 128  ;;  %s4630_s4 = smov [#allocation7]  }
  0xea   : > { %p4476_p12 = scmp.ne.s32.totalorder %s1089_s20, %s4475_s9  ;;  %s4480_s22 = sshll.u32 %s4630_s4, 4  ;;  %s4481_s22 = int_to_ptr.vmem [resolvable:$false] %s4480_s22 }
  0xeb   : > { %s4482_s29 = scalar_lea.vmem %s4481_s22, 256  ;;  %p4483_p2 = scmp.lt.s32.totalorder %s1089_s20, %s4481_s22 }
  0xec   : > { %p4478_p0 = pnand %p4476_p12, %p4436_p7  ;;  %p4484_p5 = scmp.lt.s32.totalorder %s4482_s29, %s4475_s9 }
  0xee   : > { %p4479_p1 = pneg %p4478_p0  ;;  %p4485_p13 = por %p4484_p5, %p4483_p2 }
  0xf0   : > { %p4486_p6 = pnand %p4485_p13, %p4479_p1 }
  0xf2   : > { %4489 = shalt.err (!%p4486_p6)
}
  0xf3   : > { %4078 = dma.hbm_to_vmem [thread:$0]  (!%p4972_p4), %s4977_s3, 128, %s1089_s20, %s1078_s24  }
  0xf4   : > { %p5438_p3 = scmp.ne.s32.totalorder %s5423_s26, 0 }
  0xf5   : > { %s5014_s10 = sand.u32 (!%p5438_p3), 1, %s4574_s16   ;;  %p5439_p7 = scmp.ne.s32.totalorder (!%p5438_p3), %s5434_s1, 0 }
  0xf6   : > { %1119 = sbr.rel (%p5438_p3) target bundleno = 4909 (0x132d), region = 156  ;;  %s5017_s19 = sshll.u32 (!%p5438_p3), %s5014_s10, 3 }
  0xf7   : > { %s1122_s9 = scalar_lea.sflag (!%p5438_p3), [#allocation4], %s5014_s10  ;;  %s1125_s6 = scalar_lea.vmem (!%p5438_p3), [#allocation3], %s5017_s19 }
  0xfb   : > { %4533 = dma.done.wait (%p5439_p7), %s1122_s9, 128  }
  0xfc   : > { %4535 = vsyncadd (%p5439_p7), %s1122_s9, 4294967168  ;;  %s1130_s3 = sand.u32 1, %s4838_s23   ;;  %s1134_s13 = scalar_lea.vmem [#allocation7], %s5017_s19 }
  0xfd   : > { %s1131_s26 = scalar_lea.sflag [#allocation8], %s1130_s3 }
  0xfe   : > { %4537 = dma.done.wait (%p5439_p7), %s1131_s26, 128  }
  0xff   : > { %4539 = vsyncadd (%p5439_p7), %s1131_s26, 4294967168  ;;  %p5440_p4 = scmp.eq.s32.totalorder %s4838_s23, 0 }
 0x101   : > { %4541 = dma.done.wait (%p5440_p4), [#allocation6], 16   ;;  %p5441_p8 = pmov %p5440_p4 }
 0x102   : > { %p5442_p9 = pmov %p5440_p4 }
 0x103   : > { %4543 = vsyncadd (%p5441_p8), [#allocation6], 4294967280 }
 0x104   : > { %4545 = dma.done.wait (%p5442_p9), [#allocation8], 16   ;;  %p5443_p11 = pmov %p5440_p4 }
 0x105   : > { %p5444_p10 = pmov %p5440_p4 }
 0x106   : > { %4547 = vsyncadd (%p5443_p11), [#allocation8], 4294967280 }
 0x107   : > { %4549 = dma.done.wait (%p5444_p10), [#allocation12], 32   ;;  %p5445_p12 = pmov %p5440_p4 }
 0x108   : > { %p5446_p0 = pmov %p5440_p4 }
 0x109   : > { %4551 = vsyncadd (%p5445_p12), [#allocation12], 4294967264 }
 0x10a   : > { %4553 = dma.done.wait (%p5446_p0), [#allocation15], 32   ;;  %p5447_p1 = pmov %p5446_p0 }
 0x10b   : > { %p5448_p2 = pmov %p5446_p0 }
 0x10c   : > { %4555 = vsyncadd (%p5447_p1), [#allocation15], 4294967264 }
 0x10d   : > { %4557 = dma.done.wait (%p5448_p2), [#allocation18], 1024   ;;  %p5449_p5 = pmov %p5446_p0 }
 0x10e   : > { %p5450_p13 = pmov %p5446_p0 }
 0x10f   : > { %4559 = vsyncadd (%p5449_p5), [#allocation18], 4294966272 }
 0x110   : > { %4561 = dma.done.wait (%p5450_p13), [#allocation21], 512   ;;  %p5451_p6 = pmov %p5446_p0 }
 0x112   : > { %4563 = vsyncadd (%p5451_p6), [#allocation21], 4294966784 }
 0x113   : > { %1175 = sfence }
 0x114   : > { %s5452_s5 = sld [smem:[#allocation32_spill]]  ;;  %v1311_v1 = vld [vmem:[%s5421_s8 + $0x18] sm:$0xff]  ;;  %v1310_v2 = vld [vmem:[%s5421_s8 + $0x10] sm:$0xff]  ;;  %p1282_p3 = scmp.lt.s32.totalorder %s4838_s23, 1  ;;  %v1309_v3 = vld [vmem:[%s5421_s8 + $0x8] sm:$0xff]  ;;  %vm1319_vm0 = vcmask 261120   ;;  %v1546_v30 = vlaneseq }
 0x115   : > { %3775 = vmatprep.subr.mxu0 %v1311_v1  ;;  %v1308_v4 = vld [vmem:[%s5421_s8] sm:$0xff]  ;;  %s4631_s12 = smov 96   ;;  %v4632_v14 = vmov 0   ;;  %s1405_s28 = sld [smem:[#allocation9]] }
 0x116   : > { %3776 = vmatpush3.msra.mxu0 %v1311_v1  ;;  %s5060_s1 = scalar_select %p1282_p3, %s4838_s23, 1  ;;  %v3600_v7 = vld [vmem:[#allocation10] ss:$0 sm:$0xff]  ;;  %4187 = vset.pattern.permute.xlu0 %v4632_v14  ;;  %v1547_v35 = vshrl.u32 %v1546_v30, 7 }
 0x117   : > { %3777 = vmatprep.subr.mxu0 %v1310_v2  ;;  %4188 = vset.pattern.permute.xlu1 %v4632_v14  ;;  %s3603_s22 = sld [smem:[#allocation9 + $0x1]]  ;;  %p5473_p4 = scmp.ne.s32.totalorder %s5435_s2, 0 }
 0x118   : > { %3778 = vmatpush3.msra.mxu0 %v1310_v2  ;;  %s5064_s20 = sshll.u32 %s5060_s1, 4  ;;  %s3604_s29 = sld [smem:[#allocation9 + $0x2]]  ;;  %v1548_v40 = vsub.s32 0, %v1547_v35 }
 0x119   : > { %3779 = vmatprep.subr.mxu0 %v1309_v3  ;;  %s1294_s4 = scalar_lea.vmem %s4667_s21, %s5064_s20  ;;  %s3605_s9 = sld [smem:[#allocation9 + $0x3]] }
 0x11a   : > { %s1286_s24 = scalar_lea.vmem %s5452_s5, %s5064_s20  ;;  %3780 = vmatpush3.msra.mxu0 %v1309_v3  ;;  %v1402_v15 = vld [vmem:[%s1294_s4 + $0x8] sm:$0xff]  ;;  %v1401_v16 = vld [vmem:[%s1294_s4] sm:$0xff]  ;;  %s3606_s3 = sld [smem:[#allocation9 + $0x4]] }
 0x11b   : > { %v5068_v5 = vld [vmem:[%s1286_s24] sm:$0xff]  ;;  %v5070_v6 = vld [vmem:[%s1286_s24 + $0x8] sm:$0xff]  ;;  %3781 = vmatprep.subr.mxu0 %v1308_v4  ;;  %vm1404_vm1 = vcmp.eq.s32.totalorder %v1402_v15, 0  ;;  %v1406_v17 = vstv %s1405_s28  ;;  %vm1403_vm2 = vcmp.eq.s32.totalorder %v1401_v16, 0  ;;  %vm1410_vm3 = vcmp.eq.s32.totalorder %v1402_v15, 1  ;;  %s5453_s26 = sld [smem:[#allocation34_spill]] }
 0x11c   : > { %3783 = vmatprep.mubr.msk.f32.mxu0 %vm1319_vm0, %v5068_v5  ;;  %3782 = vmatpush3.msra.mxu0 %v1308_v4  ;;  %v1408_v18 = vsel %vm1404_vm1, %v1406_v17, 0.0  ;;  %v1407_v20 = vsel %vm1403_vm2, %v1406_v17, 0.0  ;;  %vm1409_vm4 = vcmp.eq.s32.totalorder %v1401_v16, 1  ;;  %vm1416_vm5 = vcmp.eq.s32.totalorder %v1402_v15, 2  ;;  %s3607_s24 = sld [smem:[#allocation9 + $0x5]]  ;;  %s4638_s5 = smov [#allocation22]  }
 0x11d   : > { %3784 = vmatmul.mubr.msk.f32.vlgmr.msra.gmra.mxu0 %vm1319_vm0, %v5070_v6  ;;  %v1412_v19 = vstv %s3603_s22  ;;  %vm1415_vm6 = vcmp.eq.s32.totalorder %v1401_v16, 2  ;;  %vm1422_vm7 = vcmp.eq.s32.totalorder %v1402_v15, 3  ;;  %s3608_s28 = sld [smem:[#allocation9 + $0x6]]  ;;  %vm1421_vm8 = vcmp.eq.s32.totalorder %v1401_v16, 3 }
 0x11e   : > { %v1414_v21 = vsel %vm1410_vm3, %v1412_v19, %v1408_v18  ;;  %v1418_v22 = vstv %s3604_s29  ;;  %v1413_v23 = vsel %vm1409_vm4, %v1412_v19, %v1407_v20  ;;  %vm1428_vm9 = vcmp.eq.s32.totalorder %v1402_v15, 4  ;;  %s3609_s22 = sld [smem:[#allocation9 + $0x7]] }
 0x11f   : > { %v1420_v24 = vsel %vm1416_vm5, %v1418_v22, %v1414_v21  ;;  %v1424_v25 = vstv %s3605_s9  ;;  %v1419_v26 = vsel %vm1415_vm6, %v1418_v22, %v1413_v23  ;;  %vm1427_vm10 = vcmp.eq.s32.totalorder %v1401_v16, 4  ;;  %s5454_s29 = sld [smem:[#allocation40_spill]]  ;;  %s5387_s9 = smov 64  }
 0x120   : > { %v1426_v27 = vsel %vm1422_vm7, %v1424_v25, %v1420_v24  ;;  %v1430_v28 = vstv %s3606_s3  ;;  %v1425_v29 = vsel %vm1421_vm8, %v1424_v25, %v1419_v26  ;;  %vm1434_vm11 = vcmp.eq.s32.totalorder %v1402_v15, 5  ;;  %s5455_s3 = sld [smem:[#allocation42_spill]] }
 0x121   : > { %s1289_s4 = scalar_lea.vmem %s5453_s26, %s5060_s1  ;;  %v1432_v31 = vsel %vm1428_vm9, %v1430_v28, %v1426_v27  ;;  %v1431_v33 = vsel %vm1427_vm10, %v1430_v28, %v1425_v29  ;;  %vm1433_vm12 = vcmp.eq.s32.totalorder %v1401_v16, 5  ;;  %vm1440_vm13 = vcmp.eq.s32.totalorder %v1402_v15, 6  ;;  %s5456_s26 = sld [smem:[#allocation44_spill]]  ;;  %v3616_v28 = vld [vmem:[#allocation11] ss:$0 sm:$0xff] }
 0x122   : > { %v1436_v32 = vstv %s3607_s24  ;;  %v1306_v34 = vld [vmem:[%s1289_s4] sm:$0x1]  ;;  %vm1439_vm14 = vcmp.eq.s32.totalorder %v1401_v16, 6  ;;  %vm1446_vm1 = vcmp.eq.s32.totalorder %v1402_v15, 7  ;;  %vm1445_vm2 = vcmp.eq.s32.totalorder %v1401_v16, 7  ;;  %s5457_s24 = sld [smem:[#allocation46_spill]] }
 0x123   : > { %v1438_v36 = vsel %vm1434_vm11, %v1436_v32, %v1432_v31  ;;  %v1442_v37 = vstv %s3608_s28  ;;  %v1437_v38 = vsel %vm1433_vm12, %v1436_v32, %v1431_v33  ;;  %vm1544_vm15 = vcmp.gt.f32.partialorder %v1306_v34, 0.0  ;;  %s5460_s28 = sld [smem:[#allocation50_spill]] }
 0x124   : > { %v1444_v39 = vsel %vm1440_vm13, %v1442_v37, %v1438_v36  ;;  %v1448_v41 = vstv %s3609_s22  ;;  %v1443_v42 = vsel %vm1439_vm14, %v1442_v37, %v1437_v38  ;;  %v1545_v43 = vsel %vm1544_vm15, 1, %v4632_v14  ;;  %v5149_v38 = vld [vmem:[%s1125_s6] sm:$0xff]  ;;  %s5458_s6 = sld [smem:[#allocation48_spill]] }
 0x125   : > { %v1450_v46 = vsel %vm1446_vm1, %v1448_v41, %v1444_v39  ;;  %v1449_v47 = vsel %vm1445_vm2, %v1448_v41, %v1443_v42  ;;  %v5097_v49 = vrot.slane %v1545_v43, %v1548_v40  ;;  %vm1553_vm4 = vcmask 130048   ;;  %v1666_v3 = vld [vmem:[%s5454_s29 + $0x18] sm:$0xff]  ;;  %v1665_v4 = vld [vmem:[%s5454_s29 + $0x10] sm:$0xff]  ;;  %v1664_v15 = vld [vmem:[%s5454_s29 + $0x8] sm:$0xff]  ;;  %s5461_s4 = sld [smem:[#allocation49_spill]] }
 0x126   : > { %3800 = vmatprep.subr.mxu1 %v1666_v3  ;;  %v1663_v16 = vld [vmem:[%s5454_s29] sm:$0xff]  ;;  %v1760_v17 = vld [vmem:[%s5455_s3 + $0x18] sm:$0xff]  ;;  %v1759_v20 = vld [vmem:[%s5455_s3 + $0x10] sm:$0xff]  ;;  %v4634_v23 = vmov 0.0   ;;  %vm4635_vm5 = vmmov 0   ;;  %vm1866_vm6 = vcmask 523264  }
 0x127   : > { %vm1550_vm3 = vcmp.eq.s32.totalorder %v5097_v49, 1  ;;  %3801 = vmatpush3.msra.mxu1 %v1666_v3  ;;  %v1758_v21 = vld [vmem:[%s5455_s3 + $0x8] sm:$0xff]  ;;  %v1757_v22 = vld [vmem:[%s5455_s3] sm:$0xff]  ;;  %v1858_v24 = vld [vmem:[%s5456_s26 + $0x38] sm:$0xff]  ;;  %vm2114_vm8 = vcmask 64512   ;;  %s5462_s22 = sld [smem:[#allocation53_spill]] }
 0x128   : > { %3802 = vmatprep.subr.mxu1 %v1665_v4  ;;  %v1857_v25 = vld [vmem:[%s5456_s26 + $0x30] sm:$0xff]  ;;  %v1856_v26 = vld [vmem:[%s5456_s26 + $0x28] sm:$0xff]  ;;  %v1855_v27 = vld [vmem:[%s5456_s26 + $0x20] sm:$0xff]  ;;  %vm3084_vm9 = vcmask 785408  }
 0x129   : > { %3803 = vmatpush3.msra.mxu1 %v1665_v4  ;;  %v1953_v36 = vld [vmem:[%s5457_s24 + $0x18] sm:$0xff]  ;;  %v1952_v37 = vld [vmem:[%s5457_s24 + $0x10] sm:$0xff]  ;;  %v1852_v41 = vld [vmem:[%s5456_s26 + $0x8] sm:$0xff] }
 0x12a   : > { %3804 = vmatprep.subr.mxu1 %v1664_v15  ;;  %v1854_v39 = vld [vmem:[%s5456_s26 + $0x18] sm:$0xff]  ;;  %v1853_v40 = vld [vmem:[%s5456_s26 + $0x10] sm:$0xff]  ;;  %v1851_v42 = vld [vmem:[%s5456_s26] sm:$0xff] }
 0x12b   : > { %3805 = vmatpush3.msra.mxu1 %v1664_v15  ;;  %v3619_v43 = vld [vmem:[#allocation13] ss:$0 sm:$0xff]  ;;  %v2205_v3 = vld [vmem:[%s5458_s6 + $0x18] sm:$0xff]  ;;  %v2204_v4 = vld [vmem:[%s5458_s6 + $0x10] sm:$0xff] }
 0x12c   : > { %3806 = vmatprep.subr.mxu1 %v1663_v16 }
 0x12d   : > { %3807 = vmatpush3.msra.mxu1 %v1663_v16 }
 0x12e   : > { %3822 = vmatprep.subr.mxu1 %v1858_v24 }
 0x1dd   : > { %v3785_v8 = vpop.f32.mrf.mxu0 }
 0x1de   : > { %v5076_v9 = vadd.f32 %v3785_v8, %v3600_v7 }
 0x1df   : > { %v1392_v10 = vpop.f32.mrf.mxu0 }
 0x1e0   : > { %v5078_v11 = vadd.f32 %v3600_v7, %v1392_v10  ;;  %1455 = vrot.lane.b32.xlu0 %v5076_v9, %s4631_s12 }
 0x1e2   : > { %3790 = vmatprep.mubr.msk.f32.mxu0 %vm1319_vm0, %v5078_v11 }
 0x1e4   : > { %1453 = vrot.lane.b32.xlu0 %v5078_v11, %s4631_s12 }
 0x252   : > { %v1456_v12 = vpop.permute.xlu0 %1455 }
 0x253   : > { %3786 = vmatprep.subr.msk.mxu0 %vm1319_vm0, %v1456_v12 }
 0x254   : > { %3787 = vmatpush3.xpose.msk.msra.mxu0 %vm1319_vm0, %v1456_v12 }
 0x256   : > { %v1454_v13 = vpop.permute.xlu0 %1453 }
 0x257   : > { %3788 = vmatprep.subr.msk.mxu0 %vm1319_vm0, %v1454_v13 }
 0x258   : > { %3789 = vmatpush3.xpose.msk.msra.mxu0 %vm1319_vm0, %v1454_v13 }
 0x25b   : > { %3791 = vmatmul.mubr.msk.f32.vlgmr.msra.gmra.mxu0 %vm1319_vm0, %v5076_v9 }
 0x31b   : > { %v3792_v44 = vpop.f32.mrf.mxu0 }
 0x31c   : > { %v1541_v45 = vmul.f32 0.17677669, %v3792_v44 }
 0x31d   : > { %v1531_v48 = vpop.f32.mrf.mxu0 }
 0x31e   : > { %v1540_v50 = vmul.f32 0.17677669, %v1531_v48  ;;  %v1543_v51 = vadd.f32 %v1541_v45, %v1450_v46 }
 0x320   : > { %v1542_v52 = vadd.f32 %v1540_v50, %v1449_v47  ;;  %v1552_v55 = vsel %vm1550_vm3, %v1543_v51, -1e+09  ;;  %v3625_v51 = vld [vmem:[#allocation16] ss:$0 sm:$0xff] }
 0x321   : > { %v1557_v56 = vsel %vm1553_vm4, %v1552_v55, -inf }
 0x322   : > { %v1551_v53 = vsel %vm1550_vm3, %v1542_v52, -1e+09 }
 0x323   : > { %v1554_v54 = vsel %vm1553_vm4, %v1551_v53, -inf }
 0x324   : > { %1555 = vmax.xlane.f32.xlu1 %v1554_v54 }
 0x328   : > { %1558 = vmax.xlane.f32.xlu1 %v1557_v56  ;;  %v1307_v56 = vld [vmem:[%s1134_s13] sm:$0xff]  ;;  %s5459_s13 = sld [smem:[#allocation52_spill]] }
 0x329   : > { %vm2112_vm7 = vcmp.gt.f32.partialorder %v1307_v56, 0.0 }
 0x3ad   : > { %v1556_v57 = vpop.xlane.xlu1 %1555 }
 0x3ae   : > { %v1560_v58 = vsub.f32 %v1551_v53, %v1556_v57 }
 0x3b0   : > { %v1562_v59 = vmul.f32 1.442695, %v1560_v58 }
 0x3b1   : > { %v1559_v60 = vpop.xlane.xlu1 %1558 }
 0x3b2   : > { %4189 = vpow2.f32 %v1562_v59  ;;  %v1561_v61 = vsub.f32 %v1552_v55, %v1559_v60 }
 0x3b4   : > { %v1564_v62 = vmul.f32 1.442695, %v1561_v61 }
 0x3b6   : > { %4191 = vpow2.f32 %v1564_v62 }
 0x3bf   : > { %v4190_v63 = vpop.eup %4189 }
 0x3c0   : > { %v1566_v0 = vsel %vm1553_vm4, %v4190_v63, 0.0 }
 0x3c1   : > { %1567 = vadd.xlane.f32.xlu0 %v1566_v0 }
 0x3c3   : > { %v4192_v1 = vpop.eup %4191 }
 0x3c4   : > { %v1569_v2 = vsel %vm1553_vm4, %v4192_v1, 0.0 }
 0x3c5   : > { %1570 = vadd.xlane.f32.xlu1 %v1569_v2 }
 0x3d6   : > { %1578 = vrot.lane.b32.xlu1 %v5076_v9, %s5387_s9 }
 0x3da   : > { %1576 = vrot.lane.b32.xlu1 %v5078_v11, %s5387_s9 }
 0x44a   : > { %v1568_v7 = vpop.xlane.xlu0 %1567 }
 0x44b   : > { %4193 = vrcp.f32 %v1568_v7  ;;  %v2203_v7 = vld [vmem:[%s5458_s6 + $0x8] sm:$0xff] }
 0x44e   : > { %v1571_v8 = vpop.xlane.xlu1 %1570 }
 0x44f   : > { %4195 = vrcp.f32 %v1571_v8  ;;  %v2202_v8 = vld [vmem:[%s5458_s6] sm:$0xff]  ;;  %s4494_s6 = sshll.u32 %s4638_s5, 4  ;;  %s4495_s6 = int_to_ptr.vmem [resolvable:$false] %s4494_s6 }
 0x450   : > { %s4496_s8 = scalar_lea.vmem %s4495_s6, 256 }
 0x452   : > { %v1579_v10 = vpop.permute.xlu1 %1578 }
 0x453   : > { %3793 = vmatprep.subr.mxu0 %v1579_v10 }
 0x454   : > { %3794 = vmatpush3.msra.mxu0 %v1579_v10 }
 0x456   : > { %v1577_v9 = vpop.permute.xlu1 %1576 }
 0x457   : > { %3795 = vmatprep.subr.mxu0 %v1577_v9 }
 0x458   : > { %v4194_v12 = vpop.eup %4193  ;;  %3796 = vmatpush3.msra.mxu0 %v1577_v9 }
 0x459   : > { %v1573_v11 = vmul.f32 %v4194_v12, %v4190_v63  ;;  %3811 = vmatprep.subr.mxu0 %v1760_v17 }
 0x45b   : > { %3797 = vmatprep.mubr.msk.f32.mxu0 %vm1553_vm4, %v1573_v11 }
 0x45c   : > { %v4196_v13 = vpop.eup %4195 }
 0x45d   : > { %v1575_v14 = vmul.f32 %v4196_v13, %v4192_v1  ;;  %v2374_v13 = vld [vmem:[%s5459_s13 + $0x18] sm:$0xff] }
 0x45f   : > { %3798 = vmatmul.mubr.msk.f32.vlgmr.msra.gmra.mxu0 %vm1553_vm4, %v1575_v14  ;;  %v2290_v14 = vld [vmem:[%s5460_s28 + $0x18] sm:$0xff] }
 0x460   : > { %3812 = vmatpush3.msra.mxu0 %v1760_v17  ;;  %v3622_v17 = vld [vmem:[#allocation14] ss:$0 sm:$0xff] }
 0x461   : > { %3813 = vmatprep.subr.mxu0 %v1759_v20 }
 0x462   : > { %3814 = vmatpush3.msra.mxu0 %v1759_v20 }
 0x463   : > { %3815 = vmatprep.subr.mxu0 %v1758_v21 }
 0x464   : > { %3816 = vmatpush3.msra.mxu0 %v1758_v21  ;;  %v2373_v21 = vld [vmem:[%s5459_s13 + $0x10] sm:$0xff] }
 0x465   : > { %3817 = vmatprep.subr.mxu0 %v1757_v22 }
 0x466   : > { %3818 = vmatpush3.msra.mxu0 %v1757_v22 }
 0x467   : > { %3841 = vmatprep.subr.mxu0 %v4634_v23 }
 0x51f   : > { %v3799_v18 = vpop.f32.mrf.mxu0 }
 0x521   : > { %v1654_v19 = vpop.f32.mrf.mxu0 }
 0x522   : > { %3808 = vmatprep.mubr.msk.f32.mxu1 %vm1319_vm0, %v1654_v19 }
 0x523   : > { %3809 = vmatmul.mubr.msk.f32.vlgmr.msra.gmra.mxu1 %vm1319_vm0, %v3799_v18 }
 0x524   : > { %3823 = vmatpush3.msra.mxu1 %v1858_v24  ;;  %v2372_v24 = vld [vmem:[%s5459_s13 + $0x8] sm:$0xff] }
 0x525   : > { %3824 = vmatprep.subr.mxu1 %v1857_v25 }
 0x526   : > { %3825 = vmatpush3.msra.mxu1 %v1857_v25 }
 0x527   : > { %3826 = vmatprep.subr.mxu1 %v1856_v26 }
 0x528   : > { %3827 = vmatpush3.msra.mxu1 %v1856_v26  ;;  %v2371_v26 = vld [vmem:[%s5459_s13] sm:$0xff] }
 0x529   : > { %3828 = vmatprep.subr.mxu1 %v1855_v27 }
 0x52a   : > { %3829 = vmatpush3.msra.mxu1 %v1855_v27 }
 0x52b   : > { %3830 = vmatprep.subr.mxu1 %v1854_v39 }
 0x52c   : > { %3831 = vmatpush3.msra.mxu1 %v1854_v39 }
 0x52d   : > { %3832 = vmatprep.subr.mxu1 %v1853_v40 }
 0x52e   : > { %3833 = vmatpush3.msra.mxu1 %v1853_v40 }
 0x52f   : > { %3834 = vmatprep.subr.mxu1 %v1852_v41 }
 0x530   : > { %3835 = vmatpush3.msra.mxu1 %v1852_v41 }
 0x531   : > { %3836 = vmatprep.subr.mxu1 %v1851_v42 }
 0x532   : > { %3837 = vmatpush3.msra.mxu1 %v1851_v42 }
 0x533   : > { %3862 = vmatprep.subr.mxu1 %v4634_v23 }
 0x5e3   : > { %v3810_v29 = vpop.f32.mrf.mxu1 }
 0x5e4   : > { %v1752_v31 = vadd.f32 %v3810_v29, %v3616_v28  ;;  %v2288_v29 = vld [vmem:[%s5460_s28 + $0x8] sm:$0xff] }
 0x5e5   : > { %v1746_v32 = vpop.f32.mrf.mxu1 }
 0x5e6   : > { %v1747_v33 = vadd.f32 %v3616_v28, %v1746_v32  ;;  %v5133_v35 = vadd.f32 %v1752_v31, %v5070_v6  ;;  %v1950_v6 = vld [vmem:[%s5457_s24] sm:$0xff]  ;;  %v2289_v28 = vld [vmem:[%s5460_s28 + $0x10] sm:$0xff] }
 0x5e7   : > { %v2287_v31 = vld [vmem:[%s5460_s28] sm:$0xff] }
 0x5e8   : > { %v5130_v34 = vadd.f32 %v1747_v33, %v5068_v5  ;;  %v1951_v5 = vld [vmem:[%s5457_s24 + $0x8] sm:$0xff]  ;;  %v3630_v32 = vld [vmem:[%s5461_s4] ss:$0 sm:$0xff]  ;;  %s5464_s4 = sld [smem:[#allocation36_spill]] }
 0x5ea   : > { %3819 = vmatprep.mubr.msk.f32.mxu0 %vm1319_vm0, %v5130_v34 }
 0x5eb   : > { %3820 = vmatmul.mubr.msk.f32.vlgmr.msra.gmra.mxu0 %vm1319_vm0, %v5133_v35 }
 0x5ec   : > { %3842 = vmatpush3.msra.mxu0 %v1953_v36  ;;  %3849 = vmatprep.mubr.msk.f32.mxu0 %vm4635_vm5, %v4634_v23 }
 0x5ed   : > { %3843 = vmatprep.subr.mxu0 %v4634_v23 }
 0x5ee   : > { %3844 = vmatpush3.msra.mxu0 %v1952_v37  ;;  %v3634_v37 = vld [vmem:[%s5462_s22] ss:$0 sm:$0xff]  ;;  %s1302_s22 = scalar_lea.vmem %s5464_s4, %s5060_s1  ;;  %s5466_s1 = sld [smem:[#allocation56_spill]] }
 0x5ef   : > { %3845 = vmatprep.subr.mxu0 %v4634_v23  ;;  %s5468_s4 = sld [smem:[#allocation55_spill]] }
 0x5f0   : > { %3846 = vmatpush3.msra.mxu0 %v1951_v5 }
 0x5f1   : > { %3847 = vmatprep.subr.mxu0 %v4634_v23 }
 0x5f2   : > { %3848 = vmatpush3.msra.mxu0 %v1950_v6 }
 0x5f3   : > { %3850 = vmatmul.mubr.msk.f32.vlgmr.msra.gmra.mxu0 %vm1319_vm0, %v5149_v38  ;;  %3852 = vmatprep.subr.mxu0 %v4634_v23 }
 0x5f4   : > { %3854 = vmatprep.mubr.msk.f32.mxu0 %vm4635_vm5, %v4634_v23 }
 0x6ab   : > { %v3821_v44 = vpop.f32.mrf.mxu0 }
 0x6ac   : > { %v1846_v45 = vadd.f32 %v3821_v44, %v3619_v43 }
 0x6ad   : > { %v1840_v46 = vpop.f32.mrf.mxu0 }
 0x6ae   : > { %v1841_v47 = vadd.f32 %v3619_v43, %v1840_v46  ;;  %v1850_v50 = vmax.f32 %v1846_v45, 0.0 }
 0x6b0   : > { %v1849_v48 = vmax.f32 %v1841_v47, 0.0 }
 0x6b2   : > { %3838 = vmatprep.mubr.msk.f32.mxu1 %vm1866_vm6, %v1849_v48 }
 0x6b3   : > { %v2030_v52 = vpop.f32.mrf.mxu0  ;;  %3839 = vmatmul.mubr.msk.f32.vlgmr.msra.gmra.mxu1 %vm1866_vm6, %v1850_v50 }
 0x6b4   : > { %v2031_v53 = vadd.f32 %v3625_v51, %v2030_v52  ;;  %3870 = vmatprep.mubr.msk.f32.mxu1 %vm4635_vm5, %v4634_v23  ;;  %3863 = vmatpush3.msra.mxu1 %v2205_v3 }
 0x6b5   : > { %v3851_v54 = vpop.f32.mrf.mxu0  ;;  %3864 = vmatprep.subr.mxu1 %v4634_v23 }
 0x6b6   : > { %2035 = vrot.lane.b32.xlu1 %v2031_v53, %s4631_s12  ;;  %3865 = vmatpush3.msra.mxu1 %v2204_v4 }
 0x6b7   : > { %3866 = vmatprep.subr.mxu1 %v4634_v23 }
 0x6b8   : > { %3867 = vmatpush3.msra.mxu1 %v2203_v7  ;;  %v2721_v7 = vld [vmem:[#allocation19 + $0x10] sm:$0xff] }
 0x6b9   : > { %3868 = vmatprep.subr.mxu1 %v4634_v23 }
 0x6ba   : > { %3869 = vmatpush3.msra.mxu1 %v2202_v8  ;;  %v2720_v8 = vld [vmem:[#allocation19 + $0x8] sm:$0xff] }
 0x6bb   : > { %3884 = vmatprep.subr.mxu1 %v2374_v13 }
 0x728   : > { %v2036_v55 = vpop.permute.xlu1 %2035 }
 0x729   : > { %3853 = vmatpush3.xpose.msk.msra.mxu0 %vm1319_vm0, %v2036_v55 }
 0x72a   : > { %3857 = vmatprep.subr.mxu0 %v4634_v23 }
 0x72c   : > { %3855 = vmatmul.mubr.msk.f32.vlgmr.msra.gmra.mxu0 %vm1319_vm0, %v2031_v53 }
 0x72d   : > { %3859 = vmatprep.mubr.msk.f32.mxu0 %vm4635_vm5, %v4634_v23 }
 0x773   : > { %v3840_v15 = vpop.f32.mrf.mxu1 }
 0x774   : > { %v1945_v25 = vadd.f32 %v3840_v15, %v3622_v17 }
 0x775   : > { %v1939_v16 = vpop.f32.mrf.mxu1 }
 0x776   : > { %v1940_v18 = vadd.f32 %v3622_v17, %v1939_v16  ;;  %v5201_v27 = vadd.f32 %v1945_v25, %v5133_v35  ;;  %v2896_v25 = vld [vmem:[#allocation20 + $0x18] sm:$0xff] }
 0x778   : > { %v5192_v19 = vadd.f32 %v1940_v18, %v5130_v34 }
 0x7ec   : > { %v2107_v57 = vpop.f32.mrf.mxu0 }
 0x7ed   : > { %v2111_v58 = vmul.f32 0.17677669, %v2107_v57 }
 0x7ee   : > { %v3856_v59 = vpop.f32.mrf.mxu0 }
 0x7ef   : > { %v2113_v60 = vsel %vm2112_vm7, %v2111_v58, -1e+09  ;;  %v3652_v59 = vld [vmem:[%s1302_s22] ss:$0 sm:$0xff]  ;;  %s5470_s22 = sld [smem:[#allocation35_spill]] }
 0x7f0   : > { %v2115_v61 = vsel %vm2114_vm8, %v2113_v60, -inf }
 0x7f1   : > { %2116 = vmax.xlane.f32.xlu1 %v2115_v61 }
 0x87a   : > { %v2117_v62 = vpop.xlane.xlu1 %2116 }
 0x87b   : > { %v2118_v63 = vsub.f32 %v2113_v60, %v2117_v62  ;;  %v2637_v62 = vld [vmem:[#allocation17 + $0x18] sm:$0xff] }
 0x87d   : > { %v2119_v0 = vmul.f32 1.442695, %v2118_v63  ;;  %v2636_v63 = vld [vmem:[#allocation17 + $0x10] sm:$0xff] }
 0x87f   : > { %4197 = vpow2.f32 %v2119_v0  ;;  %v2635_v0 = vld [vmem:[#allocation17 + $0x8] sm:$0xff] }
 0x88c   : > { %v4198_v1 = vpop.eup %4197 }
 0x88d   : > { %v2121_v2 = vsel %vm2114_vm8, %v4198_v1, 0.0 }
 0x88e   : > { %2122 = vadd.xlane.f32.xlu0 %v2121_v2  ;;  %v2722_v2 = vld [vmem:[#allocation19 + $0x18] sm:$0xff] }
 0x8a4   : > { %2126 = vrot.lane.b32.xlu0 %v2031_v53, %s5387_s9  ;;  %s5463_s9 = sld [smem:[#allocation51_spill]] }
 0x8aa   : > { %v3632_v42 = vld [vmem:[%s5463_s9] ss:$0 sm:$0xff]  ;;  %s5465_s9 = smov 64  }
 0x917   : > { %v2123_v10 = vpop.xlane.xlu0 %2122 }
 0x918   : > { %4199 = vrcp.f32 %v2123_v10  ;;  %v2719_v10 = vld [vmem:[#allocation19] sm:$0xff] }
 0x91b   : > { %v2127_v9 = vpop.permute.xlu0 %2126 }
 0x91c   : > { %3858 = vmatpush3.msra.mxu0 %v2127_v9  ;;  %v2811_v9 = vld [vmem:[%s5466_s1 + $0x38] sm:$0xff] }
 0x91d   : > { %3873 = vmatprep.subr.mxu0 %v4634_v23 }
 0x925   : > { %v4200_v12 = vpop.eup %4199 }
 0x926   : > { %v2125_v11 = vmul.f32 %v4200_v12, %v4198_v1  ;;  %v2634_v1 = vld [vmem:[#allocation17] sm:$0xff] }
 0x927   : > { %v2810_v12 = vld [vmem:[%s5466_s1 + $0x30] sm:$0xff] }
 0x928   : > { %3860 = vmatmul.mubr.msk.f32.vlgmr.msra.gmra.mxu0 %vm2114_vm8, %v2125_v11  ;;  %v2809_v11 = vld [vmem:[%s5466_s1 + $0x28] sm:$0xff] }
 0x929   : > { %3881 = vmatprep.mubr.msk.f32.mxu0 %vm4635_vm5, %v4634_v23  ;;  %3874 = vmatpush3.msra.mxu0 %v2290_v14  ;;  %v2807_v14 = vld [vmem:[%s5466_s1 + $0x18] sm:$0xff] }
 0x92a   : > { %3875 = vmatprep.subr.mxu0 %v4634_v23 }
 0x92b   : > { %3876 = vmatpush3.msra.mxu0 %v2289_v28  ;;  %v3643_v28 = vld [vmem:[%s5468_s4] ss:$0 sm:$0xff]  ;;  %s1299_s4 = scalar_lea.vmem %s5470_s22, %s5064_s20  ;;  %s5472_s20 = sld [smem:[#allocation60_spill]] }
 0x92c   : > { %3877 = vmatprep.subr.mxu0 %v4634_v23  ;;  %s3659_s22 = sshll.u32 %s4838_s23, 7 }
 0x92d   : > { %3878 = vmatpush3.msra.mxu0 %v2288_v29 }
 0x92e   : > { %3879 = vmatprep.subr.mxu0 %v4634_v23 }
 0x92f   : > { %3880 = vmatpush3.msra.mxu0 %v2287_v31 }
 0x930   : > { %3895 = vmatprep.subr.mxu0 %v4634_v23 }
 0x9e8   : > { %v2198_v20 = vpop.f32.mrf.mxu0 }
 0x9e9   : > { %3871 = vmatmul.mubr.msk.f32.vlgmr.msra.gmra.mxu1 %vm1319_vm0, %v2198_v20 }
 0x9ea   : > { %3885 = vmatpush3.msra.mxu1 %v2374_v13  ;;  %v3861_v22 = vpop.f32.mrf.mxu0  ;;  %3892 = vmatprep.mubr.msk.f32.mxu1 %vm1319_vm0, %v5192_v19  ;;  %v2808_v13 = vld [vmem:[%s5466_s1 + $0x20] sm:$0xff] }
 0x9eb   : > { %3886 = vmatprep.subr.mxu1 %v2373_v21  ;;  %v2805_v22 = vld [vmem:[%s5466_s1 + $0x8] sm:$0xff] }
 0x9ec   : > { %3887 = vmatpush3.msra.mxu1 %v2373_v21  ;;  %v2806_v21 = vld [vmem:[%s5466_s1 + $0x10] sm:$0xff] }
 0x9ed   : > { %3888 = vmatprep.subr.mxu1 %v2372_v24 }
 0x9ee   : > { %3889 = vmatpush3.msra.mxu1 %v2372_v24  ;;  %v2804_v24 = vld [vmem:[%s5466_s1] sm:$0xff]  ;;  %s3283_s1 = scalar_lea.sflag [#allocation5], %s5014_s10 }
 0x9ef   : > { %3890 = vmatprep.subr.mxu1 %v2371_v26 }
 0x9f0   : > { %3891 = vmatpush3.msra.mxu1 %v2371_v26  ;;  %v2895_v26 = vld [vmem:[#allocation20 + $0x10] sm:$0xff] }
 0x9f1   : > { %3893 = vmatmul.mubr.msk.f32.vlgmr.msra.gmra.mxu1 %vm1319_vm0, %v5201_v27  ;;  %3902 = vmatprep.subr.mxu1 %v4634_v23 }
 0x9f2   : > { %3906 = vmatprep.mubr.msk.f32.mxu1 %vm4635_vm5, %v4634_v23 }
 0xaa9   : > { %v2282_v33 = vpop.f32.mrf.mxu1 }
 0xaaa   : > { %v2283_v34 = vadd.f32 %v3630_v32, %v2282_v33 }
 0xaab   : > { %v3872_v35 = vpop.f32.mrf.mxu1 }
 0xaac   : > { %v5216_v36 = vadd.f32 %v2283_v34, %v5149_v38  ;;  %v2894_v34 = vld [vmem:[#allocation20 + $0x8] sm:$0xff]  ;;  %v2893_v35 = vld [vmem:[#allocation20] sm:$0xff] }
 0xaae   : > { %3882 = vmatmul.mubr.msk.f32.vlgmr.msra.gmra.mxu0 %vm1319_vm0, %v5216_v36 }
 0xaaf   : > { %3899 = vmatprep.mubr.msk.f32.mxu0 %vm4635_vm5, %v4634_v23 }
 0xab1   : > { %v3894_v5 = vpop.f32.mrf.mxu1 }
 0xab2   : > { %v2460_v6 = vadd.f32 %v3894_v5, %v3634_v37 }
 0xab3   : > { %v2454_v39 = vpop.f32.mrf.mxu1 }
 0xab4   : > { %2557 = vrot.lane.b32.xlu1 %v2460_v6, %s4631_s12  ;;  %3896 = vmatpush3.xpose.msk.msra.mxu0 %vm1319_vm0, %v2460_v6  ;;  %v2455_v40 = vadd.f32 %v3634_v37, %v2454_v39 }
 0xab5   : > { %3897 = vmatprep.subr.mxu0 %v4634_v23 }
 0xab8   : > { %3898 = vmatpush3.xpose.msk.msra.mxu0 %vm1319_vm0, %v2455_v40 }
 0xab9   : > { %3909 = vmatprep.subr.mxu0 %v4634_v23 }
 0xb26   : > { %v2558_v41 = vpop.permute.xlu1 %2557 }
 0xb27   : > { %3903 = vmatpush3.msra.mxu1 %v2558_v41  ;;  %v3074_v41 = vld [vmem:[%s4807_s30 + $0x48] sm:$0xff] }
 0xb28   : > { %3904 = vmatprep.subr.mxu1 %v4634_v23 }
 0xb6e   : > { %v2367_v43 = vpop.f32.mrf.mxu0 }
 0xb6f   : > { %v2368_v44 = vadd.f32 %v3632_v42, %v2367_v43  ;;  %v3072_v42 = vld [vmem:[%s4807_s30 + $0x38] sm:$0xff]  ;;  %v3071_v43 = vld [vmem:[%s4807_s30 + $0x30] sm:$0xff] }
 0xb70   : > { %v3883_v45 = vpop.f32.mrf.mxu0 }
 0xb71   : > { %3900 = vmatmul.mubr.msk.f32.vlgmr.msra.gmra.mxu0 %vm1319_vm0, %v2368_v44  ;;  %v3070_v44 = vld [vmem:[%s4807_s30 + $0x28] sm:$0xff]  ;;  %v3069_v45 = vld [vmem:[%s4807_s30 + $0x20] sm:$0xff] }
 0xb72   : > { %3917 = vmatprep.mubr.msk.f32.mxu0 %vm4635_vm5, %v4634_v23  ;;  %3910 = vmatpush3.msra.mxu0 %v2637_v62 }
 0xb73   : > { %3911 = vmatprep.subr.mxu0 %v4634_v23 }
 0xb74   : > { %3912 = vmatpush3.msra.mxu0 %v2636_v63 }
 0xb75   : > { %3913 = vmatprep.subr.mxu0 %v4634_v23 }
 0xb76   : > { %3914 = vmatpush3.msra.mxu0 %v2635_v0  ;;  %v3181_v0 = vand.u32 127, %v1546_v30  ;;  %v3650_v30 = vld [vmem:[#allocation2] ss:$0 sm:$0xff] }
 0xb77   : > { %3915 = vmatprep.subr.mxu0 %v4634_v23 }
 0xb78   : > { %3916 = vmatpush3.msra.mxu0 %v2634_v1 }
 0xb79   : > { %3931 = vmatprep.subr.mxu0 %v4634_v23 }
 0xc31   : > { %v2538_v46 = vpop.f32.mrf.mxu0 }
 0xc32   : > { %v2542_v47 = vmul.f32 0.17677669, %v2538_v46  ;;  %v3068_v46 = vld [vmem:[%s4807_s30 + $0x18] sm:$0xff] }
 0xc33   : > { %v3901_v48 = vpop.f32.mrf.mxu0 }
 0xc34   : > { %v2543_v50 = vsel %vm1550_vm3, %v2542_v47, -1e+09  ;;  %v3067_v47 = vld [vmem:[%s4807_s30 + $0x10] sm:$0xff]  ;;  %v3066_v48 = vld [vmem:[%s4807_s30 + $0x8] sm:$0xff] }
 0xc35   : > { %v2544_v51 = vsel %vm1553_vm4, %v2543_v50, -inf }
 0xc36   : > { %2545 = vmax.xlane.f32.xlu0 %v2544_v51 }
 0xcbf   : > { %v2546_v52 = vpop.xlane.xlu0 %2545 }
 0xcc0   : > { %v2547_v53 = vsub.f32 %v2543_v50, %v2546_v52  ;;  %v3065_v50 = vld [vmem:[%s4807_s30] sm:$0xff] }
 0xcc2   : > { %v2548_v54 = vmul.f32 1.442695, %v2547_v53 }
 0xcc4   : > { %4201 = vpow2.f32 %v2548_v54 }
 0xcd1   : > { %v4202_v55 = vpop.eup %4201 }
 0xcd2   : > { %v2550_v56 = vsel %vm1553_vm4, %v4202_v55, 0.0 }
 0xcd3   : > { %2551 = vadd.xlane.f32.xlu1 %v2550_v56  ;;  %v3178_v56 = vld [vmem:[%s1299_s4] sm:$0xff] }
 0xce4   : > { %2555 = vrot.lane.b32.xlu1 %v2455_v40, %s4631_s12  ;;  %s5467_s12 = sld [smem:[#allocation54_spill]]  ;;  %v3076_v40 = vld [vmem:[%s4807_s30 + $0x58] sm:$0xff] }
 0xce8   : > { %3060 = vrot.lane.b32.xlu1 %v5149_v38, %s5465_s9  ;;  %s5469_s9 = sld [smem:[#allocation57_spill]] }
 0xcea   : > { %v3641_v15 = vld [vmem:[%s5467_s12] ss:$0 sm:$0xff]  ;;  %s5471_s12 = sld [smem:[#allocation59_spill]] }
 0xd5c   : > { %v2552_v49 = vpop.xlane.xlu1 %2551 }
 0xd5d   : > { %4203 = vrcp.f32 %v2552_v49  ;;  %v3647_v49 = vld [vmem:[%s5471_s12] ss:$0 sm:$0xff]  ;;  %s1281_s12 = scalar_lea.vmem [#allocation22], %s5017_s19 }
 0xd60   : > { %v2556_v57 = vpop.permute.xlu1 %2555 }
 0xd61   : > { %3905 = vmatpush3.msra.mxu1 %v2556_v57 }
 0xd62   : > { %3920 = vmatprep.subr.mxu1 %v4634_v23 }
 0xd6a   : > { %v4204_v58 = vpop.eup %4203 }
 0xd6b   : > { %v5243_v60 = vmul.f32 %v4204_v58, %v4202_v55  ;;  %v3179_v55 = vld [vmem:[%s1299_s4 + $0x8] sm:$0xff]  ;;  %v3061_v58 = vpop.permute.xlu1 %3060  ;;  %s3296_s4 = sshll.u32 %s1281_s12, 4  ;;  %s3297_s4 = int_to_ptr.vmem [resolvable:$true] %s3296_s4 }
 0xd6c   : > { %s4490_s3 = scalar_lea.vmem %s3297_s4, 128  ;;  %p4497_p11 = scmp.lt.s32.totalorder %s3297_s4, %s4495_s6 }
 0xd6d   : > { %3907 = vmatmul.mubr.msk.f32.vlgmr.msra.gmra.mxu1 %vm1553_vm4, %v5243_v60  ;;  %v5248_v61 = vmul.f32 %v3652_v59, %v5243_v60  ;;  %p4491_p7 = scmp.ne.s32.totalorder %s3297_s4, %s4490_s3  ;;  %p4498_p10 = scmp.lt.s32.totalorder %s4496_s8, %s4490_s3 }
 0xd6e   : > { %3928 = vmatprep.mubr.msk.f32.mxu1 %vm4635_vm5, %v4634_v23  ;;  %3921 = vmatpush3.msra.mxu1 %v2722_v2 }
 0xd6f   : > { %v3172_v38 = vsel %vm1553_vm4, %v5248_v61, 0.0  ;;  %3922 = vmatprep.subr.mxu1 %v4634_v23  ;;  %p4492_p8 = pnand %p4491_p7, %p5473_p4  ;;  %p4499_p12 = por %p4498_p10, %p4497_p11 }
 0xd70   : > { %3173 = vadd.xlane.f32.xlu1 %v3172_v38  ;;  %3923 = vmatpush3.msra.mxu1 %v2721_v7 }
 0xd71   : > { %3924 = vmatprep.subr.mxu1 %v4634_v23  ;;  %p4493_p9 = pneg %p4492_p8 }
 0xd72   : > { %3925 = vmatpush3.msra.mxu1 %v2720_v8 }
 0xd73   : > { %3926 = vmatprep.subr.mxu1 %v4634_v23  ;;  %p4500_p0 = pnand %p4499_p12, %p4493_p9 }
 0xd74   : > { %3927 = vmatpush3.msra.mxu1 %v2719_v10 }
 0xd75   : > { %3950 = vmatprep.subr.mxu1 %v4634_v23 }
 0xdf9   : > { %v3174_v59 = vpop.xlane.xlu1 %3173 }
 0xe2d   : > { %v2630_v3 = vpop.f32.mrf.mxu1 }
 0xe2e   : > { %3918 = vmatmul.mubr.msk.f32.vlgmr.msra.gmra.mxu0 %vm1319_vm0, %v2630_v3  ;;  %v4637_v3 = vmov 1.0  }
 0xe2f   : > { %v3908_v4 = vpop.f32.mrf.mxu1  ;;  %3947 = vmatprep.mubr.msk.f32.mxu0 %vm4635_vm5, %v4634_v23  ;;  %3932 = vmatpush3.msra.mxu0 %v2811_v9 }
 0xe30   : > { %3933 = vmatprep.subr.mxu0 %v4634_v23 }
 0xe31   : > { %3934 = vmatpush3.msra.mxu0 %v2810_v12 }
 0xe32   : > { %3935 = vmatprep.subr.mxu0 %v4634_v23 }
 0xe33   : > { %3936 = vmatpush3.msra.mxu0 %v2809_v11 }
 0xe34   : > { %3937 = vmatprep.subr.mxu0 %v4634_v23 }
 0xe35   : > { %3938 = vmatpush3.msra.mxu0 %v2808_v13 }
 0xe36   : > { %3939 = vmatprep.subr.mxu0 %v4634_v23 }
 0xe37   : > { %3940 = vmatpush3.msra.mxu0 %v2807_v14 }
 0xe38   : > { %3941 = vmatprep.subr.mxu0 %v4634_v23 }
 0xe39   : > { %3942 = vmatpush3.msra.mxu0 %v2806_v21 }
 0xe3a   : > { %3943 = vmatprep.subr.mxu0 %v4634_v23 }
 0xe3b   : > { %3944 = vmatpush3.msra.mxu0 %v2805_v22 }
 0xe3c   : > { %3945 = vmatprep.subr.mxu0 %v4634_v23 }
 0xe3d   : > { %3946 = vmatpush3.msra.mxu0 %v2804_v24 }
 0xe3e   : > { %3995 = vmatprep.subr.mxu0 %v4634_v23 }
 0xeee   : > { %v2714_v16 = vpop.f32.mrf.mxu0 }
 0xeef   : > { %v2715_v17 = vadd.f32 %v3641_v15, %v2714_v16 }
 0xef0   : > { %v3919_v18 = vpop.f32.mrf.mxu0 }
 0xef1   : > { %v2718_v20 = vadd.f32 %v2715_v17, %v5216_v36  ;;  %v3645_v36 = vld [vmem:[%s5469_s9] ss:$0 sm:$0xff]  ;;  %s4636_s9 = smov 32  }
 0xef3   : > { %3929 = vmatmul.mubr.msk.f32.vlgmr.msra.gmra.mxu1 %vm1319_vm0, %v2718_v20 }
 0xef4   : > { %3958 = vmatprep.mubr.msk.f32.mxu1 %vm4635_vm5, %v4634_v23  ;;  %3951 = vmatpush3.msra.mxu1 %v2896_v25 }
 0xef5   : > { %3952 = vmatprep.subr.mxu1 %v4634_v23 }
 0xef6   : > { %3953 = vmatpush3.msra.mxu1 %v2895_v26 }
 0xef7   : > { %3954 = vmatprep.subr.mxu1 %v4634_v23 }
 0xef8   : > { %3955 = vmatpush3.msra.mxu1 %v2894_v34 }
 0xef9   : > { %3956 = vmatprep.subr.mxu1 %v4634_v23 }
 0xefa   : > { %3957 = vmatpush3.msra.mxu1 %v2893_v35 }
 0xefb   : > { %3961 = vmatprep.subr.mxu1 %v4634_v23 }
 0xfb3   : > { %v2799_v29 = vpop.f32.mrf.mxu1 }
 0xfb4   : > { %v2800_v31 = vadd.f32 %v3643_v28, %v2799_v29 }
 0xfb5   : > { %v3930_v32 = vpop.f32.mrf.mxu1 }
 0xfb6   : > { %v2803_v33 = vmax.f32 %v2800_v31, 0.0 }
 0xfb8   : > { %3948 = vmatmul.mubr.msk.f32.vlgmr.msra.gmra.mxu0 %vm1866_vm6, %v2803_v33 }
 0xfb9   : > { %3999 = vmatprep.mubr.msk.f32.mxu0 %vm4635_vm5, %v4634_v23 }
0x1078   : > { %v2888_v37 = vpop.f32.mrf.mxu0 }
0x1079   : > { %v2889_v5 = vadd.f32 %v3645_v36, %v2888_v37 }
0x107a   : > { %v3949_v6 = vpop.f32.mrf.mxu0 }
0x107b   : > { %v5295_v39 = vadd.f32 %v2889_v5, %v2718_v20 }
0x107d   : > { %3959 = vmatmul.mubr.msk.f32.vlgmr.msra.gmra.mxu1 %vm1319_vm0, %v5295_v39 }
0x107e   : > { %3962 = vmatpush3.msra.mxu1 %v5201_v27  ;;  %3965 = vmatprep.mubr.msk.f32.mxu1 %vm4635_vm5, %v4634_v23  ;;  %v3075_v27 = vld [vmem:[%s4807_s30 + $0x50] sm:$0xff] }
0x107f   : > { %3963 = vmatprep.subr.mxu1 %v4634_v23 }
0x1080   : > { %3964 = vmatpush3.msra.mxu1 %v5192_v19  ;;  %v3073_v19 = vld [vmem:[%s4807_s30 + $0x40] sm:$0xff] }
0x1081   : > { %3966 = vmatmul.mubr.msk.f32.vlgmr.msra.gmra.mxu1 %vm1553_vm4, %v5243_v60  ;;  %3968 = vmatprep.subr.mxu1 %v4634_v23  ;;  %v3175_v60 = vadd.f32 1e-09, %v3174_v59 }
0x1082   : > { %3992 = vmatprep.mubr.msk.f32.mxu1 %vm4635_vm5, %v4634_v23  ;;  %3969 = vmatpush3.msra.mxu1 %v3076_v40 }
0x1083   : > { %3970 = vmatprep.subr.mxu1 %v4634_v23  ;;  %4205 = vrcp.f32 %v3175_v60 }
0x1084   : > { %3971 = vmatpush3.msra.mxu1 %v3075_v27 }
0x1085   : > { %3972 = vmatprep.subr.mxu1 %v4634_v23 }
0x1086   : > { %3973 = vmatpush3.msra.mxu1 %v3074_v41 }
0x1087   : > { %3974 = vmatprep.subr.mxu1 %v4634_v23 }
0x1088   : > { %3975 = vmatpush3.msra.mxu1 %v3073_v19 }
0x1089   : > { %3976 = vmatprep.subr.mxu1 %v4634_v23 }
0x108a   : > { %3977 = vmatpush3.msra.mxu1 %v3072_v42 }
0x108b   : > { %3978 = vmatprep.subr.mxu1 %v4634_v23 }
0x108c   : > { %3979 = vmatpush3.msra.mxu1 %v3071_v43 }
0x108d   : > { %3980 = vmatprep.subr.mxu1 %v4634_v23 }
0x108e   : > { %3981 = vmatpush3.msra.mxu1 %v3070_v44 }
0x108f   : > { %3982 = vmatprep.subr.mxu1 %v4634_v23 }
0x1090   : > { %3983 = vmatpush3.msra.mxu1 %v3069_v45  ;;  %v4206_v2 = vpop.eup %4205 }
0x1091   : > { %3984 = vmatprep.subr.mxu1 %v4634_v23  ;;  %v3177_v7 = vmul.f32 %v4206_v2, %v5248_v61 }
0x1092   : > { %3985 = vmatpush3.msra.mxu1 %v3068_v46 }
0x1093   : > { %3986 = vmatprep.subr.mxu1 %v4634_v23 }
0x1094   : > { %3987 = vmatpush3.msra.mxu1 %v3067_v47 }
0x1095   : > { %3988 = vmatprep.subr.mxu1 %v4634_v23 }
0x1096   : > { %3989 = vmatpush3.msra.mxu1 %v3066_v48 }
0x1097   : > { %3990 = vmatprep.subr.mxu1 %v4634_v23 }
0x1098   : > { %3991 = vmatpush3.msra.mxu1 %v3065_v50 }
0x113d   : > { %v2973_v51 = vpop.f32.mrf.mxu1 }
0x113e   : > { %v2974_v57 = vadd.f32 %v3647_v49, %v2973_v51 }
0x113f   : > { %v3960_v52 = vpop.f32.mrf.mxu1 }
0x1141   : > { %v3052_v53 = vpop.f32.mrf.mxu1 }
0x1142   : > { %3057 = vrot.lane.b32.xlu0 %v3052_v53, %s4636_s9  ;;  %s3294_s9 = scalar_lea.hbm %s5472_s20, %s3659_s22 }
0x1143   : > { %v3967_v54 = vpop.f32.mrf.mxu1 }
0x1146   : > { %3186 = vperm.xlu0 %4187, %v3179_v55  }
0x114a   : > { %3183 = vperm.xlu0 %4187, %v3178_v56  }
0x1169   : > { %2977 = vmax.xlane.f32.xlu0 %v2974_v57 }
0x11b4   : > { %v3058_v38 = vpop.permute.xlu0 %3057 }
0x11b5   : > { %v3063_v62 = vsel %vm1319_vm0, %v5295_v39, %v3058_v38 }
0x11b6   : > { %v3064_v63 = vsel %vm1866_vm6, %v3063_v62, %v3061_v58 }
0x11b7   : > { %3993 = vmatmul.mubr.msk.f32.vlgmr.msra.gmra.mxu1 %vm3084_vm9, %v3064_v63 }
0x11c1   : > { %v3187_v1 = vpop.permute.xlu0 %3186 }
0x11c2   : > { %vm3189_vm10 = vcmp.eq.s32.totalorder %v3187_v1, %v3181_v0 }
0x11c3   : > { %3996 = vmatpush3.msk.msra.mxu0 %vm3189_vm10, %v4637_v3 }
0x11c4   : > { %3997 = vmatprep.subr.mxu0 %v4634_v23 }
0x11c5   : > { %v3184_v4 = vpop.permute.xlu0 %3183 }
0x11c6   : > { %vm3188_vm11 = vcmp.eq.s32.totalorder %v3184_v4, %v3181_v0 }
0x11c7   : > { %3998 = vmatpush3.msk.msra.mxu0 %vm3188_vm11, %v4637_v3 }
0x11c8   : > { %4000 = vmatmul.mubr.msk.f32.vlgmr.msra.gmra.mxu0 %vm1553_vm4, %v3177_v7 }
0x11f2   : > { %v2978_v8 = vpop.xlane.xlu0 %2977 }
0x11f3   : > { %v2979_v10 = vsub.f32 %v2974_v57, %v2978_v8 }
0x11f5   : > { %v2980_v9 = vmul.f32 1.442695, %v2979_v10 }
0x11f7   : > { %4207 = vpow2.f32 %v2980_v9 }
0x1204   : > { %v4208_v12 = vpop.eup %4207 }
0x1205   : > { %2982 = vadd.xlane.f32.xlu1 %v4208_v12 }
0x1277   : > { %v3154_v11 = vpop.f32.mrf.mxu1 }
0x1278   : > { %v3155_v13 = vadd.f32 %v3650_v30, %v3154_v11 }
0x1279   : > { %v3994_v14 = vpop.f32.mrf.mxu1 }
0x127a   : > { %v3158_v15 = vsub.f32 0.0, %v3155_v13 }
0x127c   : > { %v3159_v16 = vmul.f32 1.442695, %v3158_v15 }
0x127e   : > { %4209 = vpow2.f32 %v3159_v16 }
0x1288   : > { %v3263_v23 = vpop.f32.mrf.mxu0 }
0x128a   : > { %v4001_v61 = vpop.f32.mrf.mxu0 }
0x128b   : > { %v4210_v17 = vpop.eup %4209 }
0x128c   : > { %v3161_v18 = vadd.f32 1.0, %v4210_v17 }
0x128e   : > { %4211 = vrcp.f32 %v3161_v18  ;;  %v2983_v22 = vpop.xlane.xlu1 %2982 }
0x128f   : > { %4213 = vrcp.f32 %v2983_v22 }
0x129b   : > { %v4212_v20 = vpop.eup %4211 }
0x129c   : > { %3269 = vperm.xlu1 %4188, %v4212_v20   ;;  %v3273_v21 = vsub.f32 1.0, %v4212_v20  ;;  %v4214_v24 = vpop.eup %4213 }
0x129d   : > { %v2985_v26 = vmul.f32 %v4214_v24, %v4208_v12 }
0x12a0   : > { %3276 = vperm.xlu1 %4188, %v3273_v21  }
0x1317   : > { %v3270_v25 = vpop.permute.xlu1 %3269 }
0x1318   : > { %v3272_v29 = vmul.f32 %v3270_v25, %v2985_v26 }
0x131b   : > { %v3277_v28 = vpop.permute.xlu1 %3276 }
0x131c   : > { %v3279_v31 = vmul.f32 %v3277_v28, %v3263_v23 }
0x131e   : > { %v3280_v32 = vadd.f32 %v3279_v31, %v3272_v29 }
0x1320   : > { %3281 = vst [vmem:[%s1281_s12] sm:$0xff] %v3280_v32 }
0x1321   : > { %4503 = shalt.err (!%p4500_p0)
}
0x1322   : > { %s4504_s23 = scalar_lea.hbm %s3294_s9, 128  ;;  %s4508_s10 = scalar_lea.hbm %s5472_s20, 256 }
0x1323   : > { %p4505_p1 = scmp.ne.s32.totalorder %s3294_s9, %s4504_s23  ;;  %p4509_p13 = scmp.lt.s32.totalorder %s3294_s9, %s5472_s20 }
0x1324   : > { %p4510_p6 = scmp.lt.s32.totalorder %s4508_s10, %s4504_s23 }
0x1325   : > { %p4506_p2 = pnand %p4505_p1, %p5473_p4 }
0x1326   : > { %p4511_p3 = por %p4510_p6, %p4509_p13 }
0x1327   : > { %p4507_p5 = pneg %p4506_p2 }
0x1329   : > { %p4512_p7 = pnand %p4511_p3, %p4507_p5 }
0x132b   : > { %4515 = shalt.err (!%p4512_p7)
}
0x132c   : > { %4042 = dma.vmem_to_hbm [thread:$0]  (%p5473_p4), %s3297_s4, 128, %s3294_s9, %s3283_s1  }
0x132d PF: > { %s3308_s5 = sand.u32 1, %s4570_s15   ;;  %p5474_p8 = scmp.ne.s32.totalorder %s5436_s11, 0 }
0x132e   : > { %p5475_p9 = scmp.ge.s32.totalorder %s4582_s0, 2  ;;  %s3309_s8 = scalar_lea.sflag [#allocation5], %s3308_s5 }
0x1330   : > { %p4080_p11 = pnand %p5475_p9, %p5474_p8 }
0x1332   : > { %p4081_p10 = pneg %p4080_p11 }
0x1334   : > { %4565 = dma.done.wait (%p4081_p10), %s3309_s8, 128  }
0x1335   : > { %4567 = vsyncadd (%p4081_p10), %s3309_s8, 4294967168  ;;  %p92_p12 = scmp.ge.s32.totalorder %s4935_s7, 4   ;;  %s5476_s15 = smov %s4574_s16 }
0x1336   : > { %s5477_s16 = smov %s4578_s18  ;;  %s5478_s18 = smov %s4947_s14 }
0x1337   : > { %s5479_s0 = smov %s4935_s7  ;;  %94 = sbr.rel (!%p92_p12) target bundleno = 82 (0x52), region = 300 }
0x133c   :  { %3314 = vsyncpa [#allocation4], 1 }
0x133d   :  { %3316 = vsyncpa [#allocation4 + $0x1], 1 }
0x133e   :  { %3317 = vsyncpa [#allocation8], 1 }
0x133f   :  { %3319 = vsyncpa [#allocation8 + $0x1], 1 }
0x1340   :  { %3320 = vsyncpa [#allocation12], 1 }
0x1341   :  { %3321 = vsyncpa [#allocation15], 1 }
0x1342   :  { %3322 = vsyncpa [#allocation18], 1 }
0x1343   :  { %3323 = vsyncpa [#allocation21], 1 }
0x1344   :  { %3324 = vsyncpa [#allocation5], 1 }
0x1345   :  { %3326 = vsyncpa [#allocation5 + $0x1], 1 }
0x1346   :  { %3327 = vsyncpa [#allocation6], 1 }
0x1347   :  { %3329 = vsyncpa [#allocation6 + $0x1], 1 }

</bundles_post_ra>
